<compile_context>
chip_gen: v6e
topology: v6e:2x2x1
jax: 0.10.0
libtpu: 0.0.40
codegen_flags: <defaults>
</compile_context>

<pallas_src>
import functools

import jax
import jax.numpy as jnp
from jax.experimental import pallas as pl
from jax.experimental.pallas import tpu as pltpu


def _round_up(x, m):
    return ((x + m - 1) // m) * m


def gumbel_vq_kernel(x_ref, w_ref, b_ref, cbd_ref,
                     out_ref, stats_ref,
                     *, groups, num_vars, total_bt, tb, steps_per_chunk,
                     needs_mask):
    c = pl.program_id(0)          # chunk axis ("parallel", one accumulator per chunk)
    s = pl.program_id(1)          # step axis within chunk ("arbitrary")
    gv = groups * num_vars

    @pl.when(s == 0)
    def _init():
        stats_ref[...] = jnp.zeros_like(stats_ref)

    # logits = x @ W^T + b : bf16 operands, f32 accumulation on the MXU.
    logits = jnp.dot(x_ref[...], w_ref[...],
                     preferred_element_type=jnp.float32) + b_ref[...]      # (tb, gv) f32

    # Per-group hard one-hot + softmax, all elementwise math in f32 (v5e has no bf16 VPU).
    onehot_parts = []
    prob_parts = []
    for g in range(groups):                                                # static unroll
        lg = logits[:, g * num_vars:(g + 1) * num_vars]                    # (tb, V)
        mx = jnp.max(lg, axis=-1, keepdims=True)                           # single max reuse
        iota = jax.lax.broadcasted_iota(jnp.int32, lg.shape, 1)
        is_max = lg >= mx
        # first-occurrence tie-break -> identical semantics to torch.argmax + scatter.
        first = jnp.min(jnp.where(is_max, iota, num_vars), axis=-1, keepdims=True)
        onehot_parts.append((iota == first).astype(jnp.float32))
        # softmax: EUP exp + approximate EUP reciprocal of the row-sum (off the VALU).
        e = jnp.exp(lg - mx)
        inv = pl.reciprocal(jnp.sum(e, axis=-1, keepdims=True), approx=True)
        prob_parts.append(e * inv)

    onehot = jnp.concatenate(onehot_parts, axis=-1)                        # (tb, gv)
    probs = jnp.concatenate(prob_parts, axis=-1)                           # (tb, gv)

    if needs_mask:
        # Zero out rows past the real B*T (row padding added by the wrapper).
        row = ((c * steps_per_chunk + s) * tb
               + jax.lax.broadcasted_iota(jnp.int32, (tb, 1), 0))
        valid = (row < total_bt).astype(jnp.float32)                       # (tb, 1)
        onehot = onehot * valid
        probs = probs * valid

    # One fused (tb, gv) x (gv, vq_dim) matmul against the block-diagonal codebook,
    # one full-width lane-dense store (replaces G tiny matmuls + G strided stores).
    out_ref[...] = jnp.dot(onehot, cbd_ref[...],
                           preferred_element_type=jnp.float32).astype(out_ref.dtype)

    # Single lane-contiguous (1, 2, gv) accumulation of [hard; soft] raw counts.
    hard_sum = jnp.sum(onehot, axis=0, keepdims=True)                      # (1, gv)
    soft_sum = jnp.sum(probs, axis=0, keepdims=True)                       # (1, gv)
    stats_ref[...] += jnp.concatenate([hard_sum, soft_sum],
                                      axis=0).reshape(1, 2, gv)


def gumbel_vq_forward(x, weight, bias, codebook, *, groups, num_vars, vq_dim,
                      curr_temp, combine_groups=False, tb=1024,
                      input_dtype=jnp.bfloat16):
    """x: (B, T, C) (time_first=True). weight: (G*V, C). bias: (G*V,).
    codebook: (1, num_groups*V, vq_dim // G) with num_groups = 1 if combine_groups.

    `tb` is the row tile (tunable; use 512-2048 for large B*T, budgeting
    double-buffered x/out tiles against per-generation VMEM). `input_dtype`
    controls the projection-matmul operand precision (bf16 halves x DMA traffic)."""
    bsz, tsz, dim = x.shape
    bt = bsz * tsz
    gv = groups * num_vars
    var_dim = vq_dim // groups

    # Row tile: multiple of 8, clamped to the (padded) problem size.
    tb = max(8, (int(tb) // 8) * 8)
    tb_eff = min(tb, _round_up(bt, 8))
    bt_pad = _round_up(bt, tb_eff)
    num_steps = bt_pad // tb_eff
    # Leading "parallel" chunk axis so v7x megacore can split the work; each chunk
    # owns its own probability accumulator (reduced in the wrapper).
    n_chunks = 2 if (num_steps >= 2 and num_steps % 2 == 0) else 1
    steps_per_chunk = num_steps // n_chunks
    needs_mask = bt_pad != bt

    x2 = x.reshape(bt, dim).astype(input_dtype)
    if needs_mask:
        x2 = jnp.pad(x2, ((0, bt_pad - bt), (0, 0)))
    wt = weight.T.astype(input_dtype)                     # (C, G*V)
    b2 = bias.reshape(1, gv).astype(jnp.float32)

    # Codebook rows (G*V, var_dim). combine_groups mirrors vars.repeat(1, G, 1).
    cb = codebook.reshape(-1, var_dim).astype(jnp.float32)
    if combine_groups:
        cb = jnp.tile(cb, (groups, 1))
    # Block-diagonal codebook (G*V, vq_dim): group g's codewords only feed output
    # lanes [g*var_dim, (g+1)*var_dim). Built with a group-membership mask (no
    # Python scatter loop); f32 so codewords stay exact through the select-matmul.
    row_grp = jnp.arange(gv) // num_vars
    col_grp = jnp.arange(vq_dim) // var_dim
    grp_mask = (row_grp[:, None] == col_grp[None, :]).astype(jnp.float32)
    cbd = jnp.tile(cb, (1, groups)) * grp_mask            # (gv, vq_dim)

    kernel = functools.partial(
        gumbel_vq_kernel, groups=groups, num_vars=num_vars, total_bt=bt,
        tb=tb_eff, steps_per_chunk=steps_per_chunk, needs_mask=needs_mask)

    out, stats = pl.pallas_call(
        kernel,
        grid=(n_chunks, steps_per_chunk),
        in_specs=[
            pl.BlockSpec((tb_eff, dim), lambda c, s: (c * steps_per_chunk + s, 0)),
            pl.BlockSpec((dim, gv), lambda c, s: (0, 0)),
            pl.BlockSpec((1, gv), lambda c, s: (0, 0)),
            pl.BlockSpec((gv, vq_dim), lambda c, s: (0, 0)),
        ],
        out_specs=[
            pl.BlockSpec((tb_eff, vq_dim), lambda c, s: (c * steps_per_chunk + s, 0)),
            pl.BlockSpec((1, 2, gv), lambda c, s: (c, 0, 0)),
        ],
        out_shape=[
            jax.ShapeDtypeStruct((bt_pad, vq_dim), jnp.float32),
            jax.ShapeDtypeStruct((n_chunks, 2, gv), jnp.float32),
        ],
        compiler_params=pltpu.CompilerParams(
            dimension_semantics=("parallel", "arbitrary")),
    )(x2, wt, b2, cbd)

    # O(G*V) finalize outside the kernel: normalize counts and compute perplexities.
    inv_bt = 1.0 / float(bt)
    hard_probs = (stats[:, 0, :].sum(axis=0) * inv_bt).reshape(groups, num_vars)
    avg_probs = (stats[:, 1, :].sum(axis=0) * inv_bt).reshape(groups, num_vars)
    code_perplexity = jnp.sum(
        jnp.exp(-jnp.sum(hard_probs * jnp.log(hard_probs + 1e-7), axis=-1)))
    prob_perplexity = jnp.sum(
        jnp.exp(-jnp.sum(avg_probs * jnp.log(avg_probs + 1e-7), axis=-1)))

    return {
        'num_vars': num_vars * groups,
        'code_perplexity': code_perplexity,
        'prob_perplexity': prob_perplexity,
        'temp': curr_temp,
        'x': out[:bt].reshape(bsz, tsz, vq_dim),
        'hard_probs': hard_probs,
        'avg_probs': avg_probs,
    }


def ref_forward(x, weight, bias, codebook, *, groups, num_vars, vq_dim,
                input_dtype=jnp.float32):
    """Pure-JAX reference mirroring the PyTorch eval-mode forward.
    `input_dtype` mirrors the kernel's matmul operand precision (bf16 on the MXU)."""
    bsz, tsz, dim = x.shape
    bt = bsz * tsz
    gv = groups * num_vars
    var_dim = vq_dim // groups
    xf = x.reshape(bt, dim).astype(input_dtype).astype(jnp.float32)
    wf = weight.astype(input_dtype).astype(jnp.float32)
    logits = xf @ wf.T + bias                                       # (BT, G*V)
    l3 = logits.reshape(bt, groups, num_vars)
    k = jnp.argmax(l3, axis=-1)
    hard = jax.nn.one_hot(k, num_vars, dtype=jnp.float32)           # (BT, G, V)
    hard_probs = hard.mean(axis=0)
    cperp = jnp.sum(jnp.exp(-jnp.sum(hard_probs * jnp.log(hard_probs + 1e-7),
                                     axis=-1)))
    avg_probs = jax.nn.softmax(l3, axis=-1).mean(axis=0)
    pperp = jnp.sum(jnp.exp(-jnp.sum(avg_probs * jnp.log(avg_probs + 1e-7),
                                     axis=-1)))
    cb = codebook.reshape(gv, var_dim)
    xq = (hard.reshape(bt, gv, 1) * cb[None, :, :])
    xq = xq.reshape(bt, groups, num_vars, var_dim).sum(-2).reshape(bsz, tsz, vq_dim)
    return xq, hard_probs, avg_probs, cperp, pperp


if __name__ == "__main__":
    # Module hyperparameters (small, consistent with __init__ asserts).
    dim = 32            # input channels
    num_vars = 16       # codewords per group
    groups = 2
    vq_dim = 32         # -> var_dim = 16
    temp = (2.0, 0.5, 0.999)   # curr_temp = max_temp = 2.0 (eval)

    # bt = 400 with tb=128 -> 4 row tiles (2 parallel chunks x 2 steps) plus row
    # padding, so the masking / accumulation / multi-chunk paths are all exercised.
    bsz, tsz = 2, 200

    key = jax.random.PRNGKey(0)
    k_w, k_v, k_x = jax.random.split(key, 3)

    # Deterministic parameter init mirroring the module's __init__:
    #   weight_proj: Linear(dim, groups*num_vars), weight ~ N(0,1), bias = 0
    #   vars:        (1, groups*num_vars, var_dim) ~ U(0,1)
    gv = groups * num_vars
    var_dim = vq_dim // groups
    weight = jax.random.normal(k_w, (gv, dim), dtype=jnp.float32)
    bias = jnp.zeros((gv,), dtype=jnp.float32)
    codebook = jax.random.uniform(k_v, (1, gv, var_dim), dtype=jnp.float32)

    x = jax.random.normal(k_x, (bsz, tsz, dim), dtype=jnp.float32)

    result = gumbel_vq_forward(x, weight, bias, codebook,
                               groups=groups, num_vars=num_vars, vq_dim=vq_dim,
                               curr_temp=temp[0], combine_groups=False, tb=128,
                               input_dtype=jnp.bfloat16)
    jax.block_until_ready(result['x'])

    # Reference at matched (bf16) operand precision so argmax decisions agree.
    xq_ref, hp_ref, ap_ref, cperp_ref, pperp_ref = ref_forward(
        x, weight, bias, codebook, groups=groups, num_vars=num_vars,
        vq_dim=vq_dim, input_dtype=jnp.bfloat16)

    assert jnp.allclose(result['x'], xq_ref, atol=1e-5, rtol=1e-5)
    assert jnp.allclose(result['hard_probs'], hp_ref, atol=1e-6)
    assert jnp.allclose(result['code_perplexity'], cperp_ref, atol=1e-4, rtol=1e-4)
    # The softmax denominator uses the approximate EUP reciprocal -> looser tolerance.
    assert jnp.allclose(result['avg_probs'], ap_ref, atol=3e-3)
    assert jnp.allclose(result['prob_perplexity'], pperp_ref, atol=1e-2, rtol=1e-2)

    print("KERNEL_OK")
</pallas_src>

<mosaic_0001>
module attributes {stable_mosaic.version = 11 : i64} {
  func.func @gumbel_vq_kernel(%arg0: i32, %arg1: i32, %arg2: memref<128x32xbf16, #tpu.memory_space<vmem>>, %arg3: memref<32x32xbf16, #tpu.memory_space<vmem>>, %arg4: memref<1x32xf32, #tpu.memory_space<vmem>>, %arg5: memref<32x32xf32, #tpu.memory_space<vmem>>, %arg6: memref<128x32xf32, #tpu.memory_space<vmem>>, %arg7: memref<1x2x32xf32, #tpu.memory_space<vmem>>) attributes {dimension_semantics = [#tpu.dimension_semantics<parallel>, #tpu.dimension_semantics<arbitrary>], iteration_bounds = array<i64: 2, 2>, scalar_prefetch = 0 : i64, scratch_operands = 0 : i64, tpu.core_type = #tpu.core_type<tc>, window_params = [{transform_indices = @transform_0, window_bounds = array<i64: 128, 32>}, {pipeline_mode = #tpu.pipeline_mode<synchronous>, transform_indices = @transform_1, window_bounds = array<i64: 32, 32>}, {pipeline_mode = #tpu.pipeline_mode<synchronous>, transform_indices = @transform_2, window_bounds = array<i64: 1, 32>}, {pipeline_mode = #tpu.pipeline_mode<synchronous>, transform_indices = @transform_3, window_bounds = array<i64: 32, 32>}, {transform_indices = @transform_4, window_bounds = array<i64: 128, 32>}, {transform_indices = @transform_5, window_bounds = array<i64: 1, 2, 32>}]} {
    %c0_i32 = arith.constant 0 : i32
    %0 = arith.cmpi eq, %arg1, %c0_i32 : i32
    %1 = arith.extui %0 : i1 to i32
    %c0_i32_0 = arith.constant 0 : i32
    %2 = arith.cmpi ne, %1, %c0_i32_0 : i32
    scf.if %2 {
      %cst_26 = arith.constant 0.000000e+00 : f32
      %81 = vector.broadcast %cst_26 : f32 to vector<1x2x32xf32>
      %c0_27 = arith.constant 0 : index
      %c0_28 = arith.constant 0 : index
      %c0_29 = arith.constant 0 : index
      %82 = vector.load %arg7[%c0_27, %c0_28, %c0_29] : memref<1x2x32xf32, #tpu.memory_space<vmem>>, vector<1x2x32xf32>
      tpu.vector_store %arg7[%c0_27, %c0_28, %c0_29], %81 {strides = array<i32>} : memref<1x2x32xf32, #tpu.memory_space<vmem>>, vector<1x2x32xf32>,
    } else {
    }
    %c0 = arith.constant 0 : index
    %c0_1 = arith.constant 0 : index
    %3 = vector.load %arg2[%c0, %c0_1] : memref<128x32xbf16, #tpu.memory_space<vmem>>, vector<128x32xbf16>
    %c0_2 = arith.constant 0 : index
    %c0_3 = arith.constant 0 : index
    %4 = vector.load %arg3[%c0_2, %c0_3] : memref<32x32xbf16, #tpu.memory_space<vmem>>, vector<32x32xbf16>
    %cst = arith.constant dense<0.000000e+00> : vector<128x32xf32>
    %5 = tpu.matmul %3, %4, %cst {dimension_numbers = #tpu.dot_dimension_numbers<[1], [0], [0], [1], [0, 0, 1, 1], [], []>} : vector<128x32xbf16>, vector<32x32xbf16>, vector<128x32xf32> -> vector<128x32xf32>
    %c0_4 = arith.constant 0 : index
    %c0_5 = arith.constant 0 : index
    %6 = vector.load %arg4[%c0_4, %c0_5] : memref<1x32xf32, #tpu.memory_space<vmem>>, vector<1x32xf32>
    %7 = vector.broadcast %6 : vector<1x32xf32> to vector<128x32xf32>
    %8 = arith.addf %5, %7 : vector<128x32xf32>
    %9 = vector.extract_strided_slice %8 {offsets = [0, 0], sizes = [128, 16], strides = [1, 1]} : vector<128x32xf32> to vector<128x16xf32>
    %cst_6 = arith.constant dense<0xFF800000> : vector<128xf32>
    %10 = vector.multi_reduction <maximumf>, %9, %cst_6 [1] : vector<128x16xf32> to vector<128xf32>
    %11 = vector.shape_cast %10 : vector<128xf32> to vector<128x1xf32>
    %12 = tpu.iota {dimensions = array<i32: 1>} : vector<128x16xi32>
    %13 = vector.broadcast %11 : vector<128x1xf32> to vector<128x16xf32>
    %14 = arith.cmpf oge, %9, %13 : vector<128x16xf32>
    %c16_i32 = arith.constant 16 : i32
    %15 = vector.broadcast %c16_i32 : i32 to vector<128x16xi32>
    %16 = arith.select %14, %12, %15 : vector<128x16xi1>, vector<128x16xi32>
    %cst_7 = arith.constant dense<2147483647> : vector<128xi32>
    %17 = vector.multi_reduction <minsi>, %16, %cst_7 [1] : vector<128x16xi32> to vector<128xi32>
    %18 = vector.shape_cast %17 : vector<128xi32> to vector<128x1xi32>
    %19 = vector.broadcast %18 : vector<128x1xi32> to vector<128x16xi32>
    %20 = arith.cmpi eq, %12, %19 : vector<128x16xi32>
    %21 = arith.extui %20 : vector<128x16xi1> to vector<128x16xi32>
    %22 = arith.sitofp %21 : vector<128x16xi32> to vector<128x16xf32>
    %23 = vector.broadcast %11 : vector<128x1xf32> to vector<128x16xf32>
    %24 = arith.subf %9, %23 : vector<128x16xf32>
    %25 = math.exp %24 : vector<128x16xf32>
    %cst_8 = arith.constant dense<0.000000e+00> : vector<128xf32>
    %26 = vector.multi_reduction <add>, %25, %cst_8 [1] : vector<128x16xf32> to vector<128xf32>
    %27 = vector.shape_cast %26 : vector<128xf32> to vector<128x1xf32>
    %28 = tpu.reciprocal %27 {approx = true} : vector<128x1xf32> -> vector<128x1xf32>
    %29 = vector.broadcast %28 : vector<128x1xf32> to vector<128x16xf32>
    %30 = arith.mulf %25, %29 : vector<128x16xf32>
    %31 = vector.extract_strided_slice %8 {offsets = [0, 16], sizes = [128, 16], strides = [1, 1]} : vector<128x32xf32> to vector<128x16xf32>
    %cst_9 = arith.constant dense<0xFF800000> : vector<128xf32>
    %32 = vector.multi_reduction <maximumf>, %31, %cst_9 [1] : vector<128x16xf32> to vector<128xf32>
    %33 = vector.shape_cast %32 : vector<128xf32> to vector<128x1xf32>
    %34 = tpu.iota {dimensions = array<i32: 1>} : vector<128x16xi32>
    %35 = vector.broadcast %33 : vector<128x1xf32> to vector<128x16xf32>
    %36 = arith.cmpf oge, %31, %35 : vector<128x16xf32>
    %c16_i32_10 = arith.constant 16 : i32
    %37 = vector.broadcast %c16_i32_10 : i32 to vector<128x16xi32>
    %38 = arith.select %36, %34, %37 : vector<128x16xi1>, vector<128x16xi32>
    %cst_11 = arith.constant dense<2147483647> : vector<128xi32>
    %39 = vector.multi_reduction <minsi>, %38, %cst_11 [1] : vector<128x16xi32> to vector<128xi32>
    %40 = vector.shape_cast %39 : vector<128xi32> to vector<128x1xi32>
    %41 = vector.broadcast %40 : vector<128x1xi32> to vector<128x16xi32>
    %42 = arith.cmpi eq, %34, %41 : vector<128x16xi32>
    %43 = arith.extui %42 : vector<128x16xi1> to vector<128x16xi32>
    %44 = arith.sitofp %43 : vector<128x16xi32> to vector<128x16xf32>
    %45 = vector.broadcast %33 : vector<128x1xf32> to vector<128x16xf32>
    %46 = arith.subf %31, %45 : vector<128x16xf32>
    %47 = math.exp %46 : vector<128x16xf32>
    %cst_12 = arith.constant dense<0.000000e+00> : vector<128xf32>
    %48 = vector.multi_reduction <add>, %47, %cst_12 [1] : vector<128x16xf32> to vector<128xf32>
    %49 = vector.shape_cast %48 : vector<128xf32> to vector<128x1xf32>
    %50 = tpu.reciprocal %49 {approx = true} : vector<128x1xf32> -> vector<128x1xf32>
    %51 = vector.broadcast %50 : vector<128x1xf32> to vector<128x16xf32>
    %52 = arith.mulf %47, %51 : vector<128x16xf32>
    %53 = tpu.concatenate %22, %44 in 1 : vector<128x16xf32>, vector<128x16xf32> -> vector<128x32xf32>
    %54 = tpu.concatenate %30, %52 in 1 : vector<128x16xf32>, vector<128x16xf32> -> vector<128x32xf32>
    %c2_i32 = arith.constant 2 : i32
    %55 = arith.muli %arg0, %c2_i32 : i32
    %56 = arith.addi %55, %arg1 : i32
    %c128_i32 = arith.constant 128 : i32
    %57 = arith.muli %56, %c128_i32 : i32
    %58 = tpu.iota {dimensions = array<i32: 0>} : vector<128x1xi32>
    %59 = vector.broadcast %57 : i32 to vector<128x1xi32>
    %60 = arith.addi %59, %58 : vector<128x1xi32>
    %c400_i32 = arith.constant 400 : i32
    %61 = vector.broadcast %c400_i32 : i32 to vector<128x1xi32>
    %62 = arith.cmpi slt, %60, %61 : vector<128x1xi32>
    %63 = arith.extui %62 : vector<128x1xi1> to vector<128x1xi32>
    %64 = arith.sitofp %63 : vector<128x1xi32> to vector<128x1xf32>
    %65 = vector.broadcast %64 : vector<128x1xf32> to vector<128x32xf32>
    %66 = arith.mulf %53, %65 : vector<128x32xf32>
    %67 = vector.broadcast %64 : vector<128x1xf32> to vector<128x32xf32>
    %68 = arith.mulf %54, %67 : vector<128x32xf32>
    %c0_13 = arith.constant 0 : index
    %c0_14 = arith.constant 0 : index
    %69 = vector.load %arg5[%c0_13, %c0_14] : memref<32x32xf32, #tpu.memory_space<vmem>>, vector<32x32xf32>
    %cst_15 = arith.constant dense<0.000000e+00> : vector<128x32xf32>
    %70 = tpu.matmul %66, %69, %cst_15 {dimension_numbers = #tpu.dot_dimension_numbers<[1], [0], [0], [1], [0, 0, 1, 1], [], []>} : vector<128x32xf32>, vector<32x32xf32>, vector<128x32xf32> -> vector<128x32xf32>
    %c0_16 = arith.constant 0 : index
    %c0_17 = arith.constant 0 : index
    %71 = vector.load %arg6[%c0_16, %c0_17] : memref<128x32xf32, #tpu.memory_space<vmem>>, vector<128x32xf32>
    tpu.vector_store %arg6[%c0_16, %c0_17], %70 {strides = array<i32>} : memref<128x32xf32, #tpu.memory_space<vmem>>, vector<128x32xf32>,
    %cst_18 = arith.constant dense<0.000000e+00> : vector<32xf32>
    %72 = vector.multi_reduction <add>, %66, %cst_18 [0] : vector<128x32xf32> to vector<32xf32>
    %73 = vector.shape_cast %72 : vector<32xf32> to vector<1x32xf32>
    %cst_19 = arith.constant dense<0.000000e+00> : vector<32xf32>
    %74 = vector.multi_reduction <add>, %68, %cst_19 [0] : vector<128x32xf32> to vector<32xf32>
    %75 = vector.shape_cast %74 : vector<32xf32> to vector<1x32xf32>
    %c0_20 = arith.constant 0 : index
    %c0_21 = arith.constant 0 : index
    %c0_22 = arith.constant 0 : index
    %76 = vector.load %arg7[%c0_20, %c0_21, %c0_22] : memref<1x2x32xf32, #tpu.memory_space<vmem>>, vector<1x2x32xf32>
    %77 = tpu.concatenate %73, %75 in 0 : vector<1x32xf32>, vector<1x32xf32> -> vector<2x32xf32>
    %78 = vector.shape_cast %77 : vector<2x32xf32> to vector<1x2x32xf32>
    %79 = arith.addf %76, %78 : vector<1x2x32xf32>
    %c0_23 = arith.constant 0 : index
    %c0_24 = arith.constant 0 : index
    %c0_25 = arith.constant 0 : index
    %80 = vector.load %arg7[%c0_23, %c0_24, %c0_25] : memref<1x2x32xf32, #tpu.memory_space<vmem>>, vector<1x2x32xf32>
    tpu.vector_store %arg7[%c0_23, %c0_24, %c0_25], %79 {strides = array<i32>} : memref<1x2x32xf32, #tpu.memory_space<vmem>>, vector<1x2x32xf32>,
    return
  }
  func.func @transform_0(%arg0: i32, %arg1: i32) -> (i32, i32) {
    %c2_i32 = arith.constant 2 : i32
    %0 = arith.muli %arg0, %c2_i32 : i32
    %1 = arith.addi %0, %arg1 : i32
    %c0_i32 = arith.constant 0 : i32
    %c0_i32_0 = arith.constant 0 : i32
    return %1, %c0_i32 : i32, i32
  }
  func.func @transform_1(%arg0: i32, %arg1: i32) -> (i32, i32) {
    %c0_i32 = arith.constant 0 : i32
    %c0_i32_0 = arith.constant 0 : i32
    %c0_i32_1 = arith.constant 0 : i32
    return %c0_i32, %c0_i32_0 : i32, i32
  }
  func.func @transform_2(%arg0: i32, %arg1: i32) -> (i32, i32) {
    %c0_i32 = arith.constant 0 : i32
    %c0_i32_0 = arith.constant 0 : i32
    %c0_i32_1 = arith.constant 0 : i32
    return %c0_i32, %c0_i32_0 : i32, i32
  }
  func.func @transform_3(%arg0: i32, %arg1: i32) -> (i32, i32) {
    %c0_i32 = arith.constant 0 : i32
    %c0_i32_0 = arith.constant 0 : i32
    %c0_i32_1 = arith.constant 0 : i32
    return %c0_i32, %c0_i32_0 : i32, i32
  }
  func.func @transform_4(%arg0: i32, %arg1: i32) -> (i32, i32) {
    %c2_i32 = arith.constant 2 : i32
    %0 = arith.muli %arg0, %c2_i32 : i32
    %1 = arith.addi %0, %arg1 : i32
    %c0_i32 = arith.constant 0 : i32
    %c0_i32_0 = arith.constant 0 : i32
    return %1, %c0_i32 : i32, i32
  }
  func.func @transform_5(%arg0: i32, %arg1: i32) -> (i32, i32, i32) {
    %c0_i32 = arith.constant 0 : i32
    %c0_i32_0 = arith.constant 0 : i32
    %c0_i32_1 = arith.constant 0 : i32
    return %arg0, %c0_i32, %c0_i32_0 : i32, i32, i32
  }
}

</mosaic_0001>

<bundles_post_ra>
// kernel: tpu_custom_call.1
= control target key start
LH: loop header
LB: loop body
LE: loop exit
PB: predicated region body
PF: predicated region fallthrough
CT: control target
= control target key end

     0   :  { %11 = vsyncpa [#allocation3], 0  ;;  %s4321_s0 = inlined_call_operand.vmem [shape: bf16[512,32], index: 0, kind: input, shape index: {}]   ;;  %s4322_s1 = inlined_call_operand.vmem [shape: bf16[32,32], index: 1, kind: input, shape index: {}]   ;;  %s4323_s2 = inlined_call_operand.vmem [shape: f32[1,32], index: 2, kind: input, shape index: {}]   ;;  %s4324_s3 = inlined_call_operand.vmem [shape: f32[32,32], index: 3, kind: input, shape index: {}]   ;;  %s4325_s4 = inlined_call_operand.vmem [shape: f32[512,32], index: 4, kind: output, shape index: {0}]   ;;  %s4326_s5 = inlined_call_operand.hbm [shape: f32[2,2,32], index: 5, kind: output, shape index: {1}]  }
   0x1   :  { %13 = vsyncpa [#allocation3 + $0x1], 0  ;;  %s2745_s18 = smov 0   ;;  %s2747_s19 = smov 0  }
   0x2   :  { %s2749_s20 = smov 0   ;;  %s2751_s21 = smov 0  }
   0x3   :  { %s2753_s22 = smov 0   ;;  %s2755_s23 = smov 0  }
   0x4   :  { %s2757_s24 = smov 0   ;;  %s2759_s25 = smov 0  }
   0x5 LB: > { %s2175_s26 = sadd.s32 4294967295, %s2708_s25   ;;  %s2176_s27 = sadd.s32 4294967294, %s2708_s25   ;;  %s2708_s25 = sphi %s2759_s25, %s19_s25   ;;  %s2704_s24 = sphi %s2757_s24, %s4623_s24   ;;  %s2700_s23 = sphi %s2755_s23, %s4622_s23   ;;  %s2696_s22 = sphi %s2753_s22, %s4621_s22   ;;  %s2692_s21 = sphi %s2751_s21, %s4620_s21   ;;  %s2688_s20 = sphi %s2749_s20, %s4619_s20   ;;  %s2684_s19 = sphi %s2747_s19, %s4618_s19   ;;  %s2680_s18 = sphi %s2745_s18, %s4617_s18  }
   0x6   : > { %s28_s28 = sadd.s32 1, %s2700_s23  ;;  %s31_s29 = sadd.s32 1, %s2704_s24 }
   0x7   : > { %p29_p0 = scmp.ge.s32.totalorder %s28_s28, 2  ;;  %p171_p1 = scmp.ne.s32.totalorder %s2688_s20, %s2684_s19 }
   0x8   : > { %p172_p2 = scmp.eq.s32.totalorder %s2175_s26, 3  ;;  %p177_p4 = scmp.ne.s32.totalorder %s2684_s19, %s2680_s18 }
   0x9   : > { %s4625_s28 = smov (%p29_p0, %s28_s28), 0  ;;  %s4627_s29 = smov (!%p29_p0, %s31_s29), %s2704_s24 }
   0xa   : > { %4433 = sst [smem:[#allocation5_spill]] %s4625_s28  ;;  %p2794_p3 = por %p172_p2, %p171_p1 }
   0xb   : > { %p33_p5 = scmp.ge.s32.totalorder %s4627_s29, 2  ;;  %p178_p6 = scmp.eq.s32.totalorder %s2176_s27, 3 }
   0xc   : > { %p2183_p7 = scmp.ge.s32.totalorder %s2708_s25, 1  ;;  %p218_p8 = scmp.lt.s32.totalorder %s2708_s25, 5 }
   0xd   : > { %s4629_s29 = smov (%p33_p5, %s4627_s29), 0  ;;  %p2804_p9 = por %p178_p6, %p177_p4 }
   0xe   : > { %4435 = sst [smem:[#allocation6_spill]] %s4629_s29  ;;  %p219_p10 = pnand %p2183_p7, %p218_p8 }
   0xf   : > { %s158_s7 = ssub.s32 %s2704_s24, %s4629_s29  ;;  %s161_s8 = sadd.s32 1, %s2688_s20 }
  0x10   : > { %p159_p11 = scmp.eq.s32.totalorder %s158_s7, 0  ;;  %222 = sbr.rel (%p219_p10) target bundleno = 1140 (0x474), region = 36 }
  0x12   : > { %s2812_s9 = scalar_select %p159_p11, %s2688_s20, %s161_s8  }
  0x15   : > { %s252_s10 = sand.u32 1, %s2684_s19   ;;  %s2185_s11 = sshll.u32 %s2696_s22, 1 }
  0x16   : > { %s2184_s12 = sshll.u32 %s252_s10, 1  ;;  %s2819_s13 = sadd.s32 %s2692_s21, %s2185_s11 }
  0x17   : > { %s2186_s14 = sshll.u32 %s2819_s13, 4  ;;  %s2832_s28 = scalar_lea.vmem [#allocation2], %s2184_s12 }
  0x18   : > { %p258_p12 = scmp.lt.s32.totalorder %s2186_s14, 63  ;;  %p2191_p13 = scmp.ne.s32.totalorder %s2692_s21, 0 }
  0x1a   : > { %s4631_s14 = smov (!%p258_p12, %s2186_s14), 63  ;;  %279 = sbr.rel (%p2191_p13) target bundleno = 33 (0x21), region = 40 }
  0x1b   : > { %s2187_s15 = sshll.u32 %s4631_s14, 2  ;;  %s2190_s16 = sshll.u32 %s4631_s14, 3 }
  0x1c   : > { %s2825_s27 = scalar_lea.vmem %s4321_s0, %s2187_s15  ;;  %s2830_s29 = scalar_lea.vmem %s4325_s4, %s2190_s16 }
  0x1f   : > { %vm280_vm0 = vcmask 254976   ;;  %v2710_v0 = vmov 0.0  }
  0x20   : > { %281 = vst.msk [vmem:[%s2832_s28] sm:$0x3] %vm280_vm0, %v2710_v0 }
  0x21 PF: > { %v2478_v1 = vld [vmem:[%s4322_s1 + $0x8] sm:$0xff]   ;;  %vm361_vm1 = vcmask 261120   ;;  %v4328_v2 = vlaneseq  ;;  %v2479_v3 = vld [vmem:[%s4322_s1] sm:$0xff]   ;;  %s2711_s21 = smov 16   ;;  %v2482_v7 = vld [vmem:[%s2825_s27 + $0x10] sm:$0xff]   ;;  %vm982_vm2 = vcmask 261248  }
  0x22   : > { %2311 = vmatprep.subr.bf16.mxu0 %v2478_v1  ;;  %v2480_v4 = vld [vmem:[%s2825_s27] sm:$0xff]   ;;  %v2481_v6 = vld [vmem:[%s2825_s27 + $0x8] sm:$0xff]   ;;  %v2483_v8 = vld [vmem:[%s2825_s27 + $0x18] sm:$0xff]   ;;  %vm483_vm3 = vcmask 130048   ;;  %s2713_s16 = smov 112   ;;  %s2059_s7 = scalar_lea.sflag [#allocation3], %s252_s10 }
  0x23   : > { %v2844_v5 = vand.u32 127, %v4328_v2  ;;  %2312 = vmatpush3.bf16.msra.mxu0 %v2478_v1  ;;  %2315 = vmatprep.mubr.msk.bf16.mxu0 %vm361_vm1, %v2480_v4  ;;  %v2484_v9 = vld [vmem:[%s2825_s27 + $0x20] sm:$0xff]   ;;  %v2485_v10 = vld [vmem:[%s2825_s27 + $0x28] sm:$0xff]   ;;  %v2486_v11 = vld [vmem:[%s2825_s27 + $0x30] sm:$0xff]   ;;  %s2714_s11 = smov [#allocation2]  }
  0x24   : > { %2313 = vmatprep.subr.bf16.mxu0 %v2479_v3  ;;  %v2487_v12 = vld [vmem:[%s2825_s27 + $0x38] sm:$0xff]   ;;  %v2866_v13 = vld [vmem:[%s4323_s2] ss:$0 sm:$0xff]  ;;  %s2620_s14 = sshll.u32 %s2714_s11, 4  ;;  %s2621_s14 = int_to_ptr.vmem [resolvable:$false] %s2620_s14 }
  0x25   : > { %4437 = vst [vmem:[#allocation7_spill] sm:$0xff] %v2844_v5  ;;  %1047 = vrot.lane.b32.xlu0 %v2844_v5, %s2711_s21 }
  0x27   : > { %2314 = vmatpush3.bf16.msra.mxu0 %v2479_v3 }
  0x2a   : > { %2316 = vmatmul.mubr.msk.bf16.vlgmr.msra.gmra.mxu0 %vm361_vm1, %v2481_v6 }
  0x2b   : > { %2319 = vmatprep.mubr.msk.bf16.mxu0 %vm361_vm1, %v2482_v7 }
  0x32   : > { %2320 = vmatmul.mubr.msk.bf16.gmra.mxu0 %vm361_vm1, %v2483_v8 }
  0x33   : > { %2323 = vmatprep.mubr.msk.bf16.mxu0 %vm361_vm1, %v2484_v9 }
  0x3a   : > { %2324 = vmatmul.mubr.msk.bf16.gmra.mxu0 %vm361_vm1, %v2485_v10 }
  0x3b   : > { %2327 = vmatprep.mubr.msk.bf16.mxu0 %vm361_vm1, %v2486_v11 }
  0x42   : > { %2328 = vmatmul.mubr.msk.bf16.gmra.mxu0 %vm361_vm1, %v2487_v12 }
  0xea   : > { %v2317_v14 = vpop.f32.mrf.mxu0 }
  0xeb   : > { %v2869_v15 = vadd.f32 %v2317_v14, %v2866_v13 }
  0xec   : > { %v420_v16 = vpop.f32.mrf.mxu0 }
  0xed   : > { %4438 = vst [vmem:[#allocation8_spill] sm:$0xff] %v2869_v15  ;;  %v2872_v17 = vadd.f32 %v2866_v13, %v420_v16  ;;  %v989_v18 = vsel %vm982_vm2, %v2869_v15, -inf  ;;  %v490_v23 = vsel %vm483_vm3, %v2869_v15, -inf }
  0xee   : > { %990 = vmax.xlane.f32.xlu1 %v989_v18  ;;  %v2318_v19 = vpop.f32.mrf.mxu0  ;;  %v2980_v18 = vpop.permute.xlu0 %1047 }
  0xef   : > { %4439 = vst [vmem:[#allocation9_spill] sm:$0xff] %v2872_v17  ;;  %v983_v20 = vsel %vm982_vm2, %v2872_v17, -inf  ;;  %v2889_v28 = vadd.f32 %v2318_v19, %v2866_v13  ;;  %v484_v29 = vsel %vm483_vm3, %v2872_v17, -inf }
  0xf0   : > { %v423_v21 = vpop.f32.mrf.mxu0  ;;  %984 = vmax.xlane.f32.xlu0 %v983_v20 }
  0xf1   : > { %v2879_v22 = vadd.f32 %v2866_v13, %v423_v21  ;;  %4442 = vst [vmem:[#allocation12_spill] sm:$0xff] %v2889_v28  ;;  %v992_v34 = vsel %vm982_vm2, %v2889_v28, -inf  ;;  %v493_v39 = vsel %vm483_vm3, %v2889_v28, -inf }
  0xf2   : > { %491 = vmax.xlane.f32.xlu1 %v490_v23  ;;  %v2321_v24 = vpop.f32.mrf.mxu0 }
  0xf3   : > { %4440 = vst [vmem:[#allocation10_spill] sm:$0xff] %v2879_v22  ;;  %v2884_v25 = vadd.f32 %v2321_v24, %v2866_v13  ;;  %v986_v26 = vsel %vm982_vm2, %v2879_v22, -inf  ;;  %v487_v43 = vsel %vm483_vm3, %v2879_v22, -inf }
  0xf4   : > { %987 = vmax.xlane.f32.xlu0 %v986_v26  ;;  %v436_v27 = vpop.f32.mrf.mxu0 }
  0xf5   : > { %4441 = vst [vmem:[#allocation11_spill] sm:$0xff] %v2884_v25  ;;  %v2894_v30 = vadd.f32 %v2866_v13, %v436_v27  ;;  %v1001_v31 = vsel %vm982_vm2, %v2884_v25, -inf  ;;  %v502_v47 = vsel %vm483_vm3, %v2884_v25, -inf }
  0xf6   : > { %485 = vmax.xlane.f32.xlu1 %v484_v29  ;;  %v2322_v32 = vpop.f32.mrf.mxu0 }
  0xf7   : > { %4443 = vst [vmem:[#allocation13_spill] sm:$0xff] %v2894_v30  ;;  %v2901_v35 = vadd.f32 %v2322_v32, %v2866_v13  ;;  %v995_v36 = vsel %vm982_vm2, %v2894_v30, -inf  ;;  %v496_v51 = vsel %vm483_vm3, %v2894_v30, -inf }
  0xf8   : > { %1002 = vmax.xlane.f32.xlu0 %v1001_v31  ;;  %v439_v33 = vpop.f32.mrf.mxu0 }
  0xf9   : > { %4444 = vst [vmem:[#allocation14_spill] sm:$0xff] %v2901_v35  ;;  %v505_v41 = vsel %vm483_vm3, %v2901_v35, -inf  ;;  %v2934_v54 = vadd.f32 %v2866_v13, %v439_v33  ;;  %v1004_v55 = vsel %vm982_vm2, %v2901_v35, -inf }
  0xfa   : > { %993 = vmax.xlane.f32.xlu1 %v992_v34  ;;  %v2325_v37 = vpop.f32.mrf.mxu0 }
  0xfb   : > { %v2908_v40 = vadd.f32 %v2325_v37, %v2866_v13  ;;  %4449 = vst [vmem:[#allocation19_spill] sm:$0xff] %v2934_v54  ;;  %v998_v58 = vsel %vm982_vm2, %v2934_v54, -inf  ;;  %v499_v62 = vsel %vm483_vm3, %v2934_v54, -inf }
  0xfc   : > { %996 = vmax.xlane.f32.xlu0 %v995_v36  ;;  %v452_v38 = vpop.f32.mrf.mxu0 }
  0xfd   : > { %4445 = vst [vmem:[#allocation15_spill] sm:$0xff] %v2908_v40  ;;  %v514_v45 = vsel %vm483_vm3, %v2908_v40, -inf  ;;  %v2955_v3 = vadd.f32 %v2866_v13, %v452_v38  ;;  %v1013_v4 = vsel %vm982_vm2, %v2908_v40, -inf }
  0xfe   : > { %494 = vmax.xlane.f32.xlu1 %v493_v39  ;;  %v2326_v42 = vpop.f32.mrf.mxu0 }
  0xff   : > { %v2915_v44 = vadd.f32 %v2326_v42, %v2866_v13  ;;  %4452 = vst [vmem:[#allocation22_spill] sm:$0xff] %v2955_v3  ;;  %v1007_v8 = vsel %vm982_vm2, %v2955_v3, -inf  ;;  %v508_v10 = vsel %vm483_vm3, %v2955_v3, -inf }
 0x100   : > { %506 = vmax.xlane.f32.xlu0 %v505_v41  ;;  %v455_v46 = vpop.f32.mrf.mxu0 }
 0x101   : > { %4446 = vst [vmem:[#allocation16_spill] sm:$0xff] %v2915_v44  ;;  %v2922_v48 = vadd.f32 %v2866_v13, %v455_v46  ;;  %v517_v49 = vsel %vm483_vm3, %v2915_v44, -inf  ;;  %v1016_v11 = vsel %vm982_vm2, %v2915_v44, -inf }
 0x102   : > { %488 = vmax.xlane.f32.xlu1 %v487_v43  ;;  %v2329_v50 = vpop.f32.mrf.mxu0 }
 0x103   : > { %4447 = vst [vmem:[#allocation17_spill] sm:$0xff] %v2922_v48  ;;  %v2929_v52 = vadd.f32 %v2329_v50, %v2866_v13  ;;  %v511_v53 = vsel %vm483_vm3, %v2922_v48, -inf  ;;  %v1010_v12 = vsel %vm982_vm2, %v2922_v48, -inf }
 0x104   : > { %515 = vmax.xlane.f32.xlu0 %v514_v45  ;;  %v468_v57 = vpop.f32.mrf.mxu0 }
 0x105   : > { %4448 = vst [vmem:[#allocation18_spill] sm:$0xff] %v2929_v52  ;;  %v1025_v56 = vsel %vm982_vm2, %v2929_v52, -inf  ;;  %v2943_v59 = vadd.f32 %v2866_v13, %v468_v57  ;;  %v526_v60 = vsel %vm483_vm3, %v2929_v52, -inf }
 0x106   : > { %503 = vmax.xlane.f32.xlu1 %v502_v47  ;;  %v2330_v61 = vpop.f32.mrf.mxu0 }
 0x107   : > { %4450 = vst [vmem:[#allocation20_spill] sm:$0xff] %v2943_v59  ;;  %v2950_v63 = vadd.f32 %v2330_v61, %v2866_v13  ;;  %v520_v0 = vsel %vm483_vm3, %v2943_v59, -inf }
 0x108   : > { %518 = vmax.xlane.f32.xlu0 %v517_v49  ;;  %v471_v1 = vpop.f32.mrf.mxu0 }
 0x109   : > { %4451 = vst [vmem:[#allocation21_spill] sm:$0xff] %v2950_v63  ;;  %v2960_v6 = vadd.f32 %v2866_v13, %v471_v1  ;;  %v529_v7 = vsel %vm483_vm3, %v2950_v63, -inf  ;;  %v1019_v13 = vsel %vm982_vm2, %v2943_v59, -inf  ;;  %v1028_v14 = vsel %vm982_vm2, %v2950_v63, -inf }
 0x10a   : > { %497 = vmax.xlane.f32.xlu1 %v496_v51 }
 0x10b   : > { %4453 = vst [vmem:[#allocation23_spill] sm:$0xff] %v2960_v6  ;;  %v523_v9 = vsel %vm483_vm3, %v2960_v6, -inf  ;;  %v1022_v16 = vsel %vm982_vm2, %v2960_v6, -inf }
 0x10c   : > { %512 = vmax.xlane.f32.xlu0 %v511_v53 }
 0x10e   : > { %1005 = vmax.xlane.f32.xlu1 %v1004_v55 }
 0x110   : > { %1026 = vmax.xlane.f32.xlu0 %v1025_v56 }
 0x112   : > { %999 = vmax.xlane.f32.xlu1 %v998_v58 }
 0x114   : > { %527 = vmax.xlane.f32.xlu0 %v526_v60 }
 0x116   : > { %500 = vmax.xlane.f32.xlu1 %v499_v62 }
 0x118   : > { %521 = vmax.xlane.f32.xlu0 %v520_v0 }
 0x11a   : > { %1014 = vmax.xlane.f32.xlu1 %v1013_v4 }
 0x11c   : > { %530 = vmax.xlane.f32.xlu0 %v529_v7 }
 0x11e   : > { %1008 = vmax.xlane.f32.xlu1 %v1007_v8 }
 0x120   : > { %524 = vmax.xlane.f32.xlu0 %v523_v9 }
 0x122   : > { %509 = vmax.xlane.f32.xlu1 %v508_v10 }
 0x126   : > { %1017 = vmax.xlane.f32.xlu1 %v1016_v11 }
 0x12a   : > { %1011 = vmax.xlane.f32.xlu1 %v1010_v12 }
 0x12e   : > { %1020 = vmax.xlane.f32.xlu1 %v1019_v13 }
 0x132   : > { %1029 = vmax.xlane.f32.xlu1 %v1028_v14 }
 0x136   : > { %1023 = vmax.xlane.f32.xlu1 %v1022_v16 }
 0x177   : > { %v2982_v19 = vpop.xlane.xlu1 %990 }
 0x178   : > { %4454 = vst [vmem:[#allocation24_spill] sm:$0xff] %v2982_v19  ;;  %vm1033_vm4 = vcmp.ge.f32.partialorder %v2869_v15, %v2982_v19 }
 0x179   : > { %v2986_v20 = vpop.xlane.xlu0 %984  ;;  %v1051_v21 = vsel %vm1033_vm4, %v2980_v18, 16 }
 0x17a   : > { %4455 = vst [vmem:[#allocation25_spill] sm:$0xff] %v2986_v20  ;;  %vm1031_vm5 = vcmp.ge.f32.partialorder %v2872_v17, %v2986_v20  ;;  %v2992_v23 = vsel %vm982_vm2, %v1051_v21, 2147483647 }
 0x17b   : > { %v2994_v24 = vpop.xlane.xlu1 %491  ;;  %v1097_v26 = vshra.s32 %v2992_v23, 16  ;;  %v1049_v32 = vsel %vm1031_vm5, %v2980_v18, 16 }
 0x17c   : > { %4456 = vst [vmem:[#allocation26_spill] sm:$0xff] %v2994_v24  ;;  %vm536_vm6 = vcmp.ge.f32.partialorder %v2869_v15, %v2994_v24  ;;  %v3014_v36 = vsel %vm982_vm2, %v1049_v32, 2147483647 }
 0x17d   : > { %v2999_v27 = vpop.xlane.xlu0 %987  ;;  %v3001_v29 = vcvt.s32.f32 %v1097_v26  ;;  %v552_v31 = vsel %vm536_vm6, %v2844_v5, 16  ;;  %v1067_v43 = vshra.s32 %v3014_v36, 16 }
 0x17e   : > { %4457 = vst [vmem:[#allocation27_spill] sm:$0xff] %v2999_v27  ;;  %v3009_v34 = vsel %vm483_vm3, %v552_v31, 2147483647  ;;  %vm1032_vm9 = vcmp.ge.f32.partialorder %v2879_v22, %v2999_v27 }
 0x17f   : > { %1100 = vmin.xlane.f32.xlu1 %v3001_v29  ;;  %v3006_v33 = vpop.xlane.xlu1 %485  ;;  %v598_v37 = vshra.s32 %v3009_v34, 16  ;;  %v3034_v47 = vcvt.s32.f32 %v1067_v43  ;;  %v1050_v56 = vsel %vm1032_vm9, %v2980_v18, 16 }
 0x180   : > { %4458 = vst [vmem:[#allocation28_spill] sm:$0xff] %v3006_v33  ;;  %vm534_vm7 = vcmp.ge.f32.partialorder %v2872_v17, %v3006_v33  ;;  %v3062_v62 = vsel %vm982_vm2, %v1050_v56, 2147483647 }
 0x181   : > { %v550_v38 = vsel %vm534_vm7, %v2844_v5, 16  ;;  %v3018_v39 = vpop.xlane.xlu0 %1002  ;;  %v3020_v41 = vcvt.s32.f32 %v598_v37  ;;  %v1082_v11 = vshra.s32 %v3062_v62, 16 }
 0x182   : > { %4459 = vst [vmem:[#allocation29_spill] sm:$0xff] %v3018_v39  ;;  %v3028_v45 = vsel %vm483_vm3, %v550_v38, 2147483647  ;;  %vm1037_vm11 = vcmp.ge.f32.partialorder %v2884_v25, %v3018_v39 }
 0x183   : > { %v3022_v42 = vpop.xlane.xlu1 %993  ;;  %601 = vmin.xlane.f32.xlu1 %v3020_v41  ;;  %v568_v50 = vshra.s32 %v3028_v45, 16  ;;  %v1055_v4 = vsel %vm1037_vm11, %v2980_v18, 16  ;;  %v3091_v21 = vcvt.s32.f32 %v1082_v11 }
 0x184   : > { %4460 = vst [vmem:[#allocation30_spill] sm:$0xff] %v3022_v42  ;;  %vm1034_vm8 = vcmp.ge.f32.partialorder %v2889_v28, %v3022_v42  ;;  %v3083_v13 = vsel %vm982_vm2, %v1055_v4, 2147483647 }
 0x185   : > { %v1052_v46 = vsel %vm1034_vm8, %v2980_v18, 16  ;;  %v3044_v53 = vpop.xlane.xlu0 %996  ;;  %v3051_v57 = vcvt.s32.f32 %v568_v50  ;;  %v1157_v32 = vshra.s32 %v3083_v13, 16 }
 0x186   : > { %v3042_v51 = vsel %vm982_vm2, %v1052_v46, 2147483647  ;;  %4462 = vst [vmem:[#allocation32_spill] sm:$0xff] %v3044_v53  ;;  %vm1035_vm14 = vcmp.ge.f32.partialorder %v2894_v30, %v3044_v53 }
 0x187   : > { %v3036_v49 = vpop.xlane.xlu1 %494  ;;  %1070 = vmin.xlane.f32.xlu1 %v3034_v47  ;;  %v1112_v60 = vshra.s32 %v3042_v51, 16  ;;  %v1053_v43 = vsel %vm1035_vm14, %v2980_v18, 16  ;;  %v3110_v46 = vcvt.s32.f32 %v1157_v32 }
 0x188   : > { %4461 = vst [vmem:[#allocation31_spill] sm:$0xff] %v3036_v49  ;;  %vm537_vm10 = vcmp.ge.f32.partialorder %v2889_v28, %v3036_v49  ;;  %v3118_v56 = vsel %vm982_vm2, %v1053_v43, 2147483647 }
 0x189   : > { %v553_v55 = vsel %vm537_vm10, %v2844_v5, 16  ;;  %v3068_v7 = vpop.xlane.xlu0 %506  ;;  %v3070_v8 = vcvt.s32.f32 %v1112_v60 }
 0x18a   : > { %v3057_v61 = vsel %vm483_vm3, %v553_v55, 2147483647  ;;  %4464 = vst [vmem:[#allocation34_spill] sm:$0xff] %v3068_v7  ;;  %vm541_vm15 = vcmp.ge.f32.partialorder %v2901_v35, %v3068_v7 }
 0x18b   : > { %v3053_v58 = vpop.xlane.xlu1 %488  ;;  %571 = vmin.xlane.f32.xlu1 %v3051_v57  ;;  %v613_v0 = vshra.s32 %v3057_v61, 16 }
 0x18c   : > { %4463 = vst [vmem:[#allocation33_spill] sm:$0xff] %v3053_v58  ;;  %vm535_vm12 = vcmp.ge.f32.partialorder %v2879_v22, %v3053_v58 }
 0x18d   : > { %v551_v1 = vsel %vm535_vm12, %v2844_v5, 16  ;;  %v3072_v9 = vcvt.s32.f32 %v613_v0  ;;  %v3101_v38 = vpop.xlane.xlu0 %515 }
 0x18e   : > { %v3078_v12 = vsel %vm483_vm3, %v551_v1, 2147483647  ;;  %4467 = vst [vmem:[#allocation37_spill] sm:$0xff] %v3101_v38  ;;  %v557_v1 = vsel %vm541_vm15, %v2844_v5, 16  ;;  %vm544_vm7 = vcmp.ge.f32.partialorder %v2908_v40, %v3101_v38 }
 0x18f   : > { %v3074_v10 = vpop.xlane.xlu1 %503  ;;  %1115 = vmin.xlane.f32.xlu1 %v3070_v8  ;;  %616 = vmin.xlane.f32.xlu0 %v3072_v9  ;;  %v583_v14 = vshra.s32 %v3078_v12, 16  ;;  %v3140_v2 = vsel %vm483_vm3, %v557_v1, 2147483647 }
 0x190   : > { %4465 = vst [vmem:[#allocation35_spill] sm:$0xff] %v3074_v10  ;;  %vm540_vm13 = vcmp.ge.f32.partialorder %v2884_v25, %v3074_v10 }
 0x191   : > { %v556_v16 = vsel %vm540_vm13, %v2844_v5, 16  ;;  %v3093_v26 = vcvt.s32.f32 %v583_v14  ;;  %v3124_v4 = vpop.xlane.xlu0 %518 }
 0x192   : > { %v3099_v37 = vsel %vm483_vm3, %v556_v16, 2147483647  ;;  %4469 = vst [vmem:[#allocation39_spill] sm:$0xff] %v3124_v4  ;;  %v1127_v16 = vshra.s32 %v3118_v56, 16  ;;  %vm545_vm10 = vcmp.ge.f32.partialorder %v2915_v44, %v3124_v4 }
 0x193   : > { %v3095_v31 = vpop.xlane.xlu1 %497  ;;  %1085 = vmin.xlane.f32.xlu1 %v3091_v21  ;;  %586 = vmin.xlane.f32.xlu0 %v3093_v26  ;;  %v658_v55 = vshra.s32 %v3099_v37, 16 }
 0x194   : > { %4466 = vst [vmem:[#allocation36_spill] sm:$0xff] %v3095_v31  ;;  %vm538_vm0 = vcmp.ge.f32.partialorder %v2894_v30, %v3095_v31  ;;  %v3145_v31 = vcvt.s32.f32 %v1127_v16 }
 0x195   : > { %v554_v0 = vsel %vm538_vm0, %v2844_v5, 16  ;;  %v3126_v11 = vcvt.s32.f32 %v658_v55  ;;  %v3158_v24 = vpop.xlane.xlu0 %512 }
 0x196   : > { %v3137_v43 = vsel %vm483_vm3, %v554_v0, 2147483647  ;;  %v673_v0 = vshra.s32 %v3140_v2, 16  ;;  %4472 = vst [vmem:[#allocation42_spill] sm:$0xff] %v3158_v24  ;;  %vm543_vm15 = vcmp.ge.f32.partialorder %v2922_v48, %v3158_v24 }
 0x197   : > { %v3112_v50 = vpop.xlane.xlu1 %1005  ;;  %1160 = vmin.xlane.f32.xlu1 %v3110_v46  ;;  %v628_v49 = vshra.s32 %v3137_v43, 16 }
 0x198   : > { %4468 = vst [vmem:[#allocation38_spill] sm:$0xff] %v3112_v50  ;;  %vm1038_vm4 = vcmp.ge.f32.partialorder %v2901_v35, %v3112_v50  ;;  %v3167_v58 = vcvt.s32.f32 %v673_v0  ;;  %v560_v0 = vsel %vm544_vm7, %v2844_v5, 16 }
 0x199   : > { %v1056_v60 = vsel %vm1038_vm4, %v2980_v18, 16  ;;  %v3182_v35 = vpop.xlane.xlu0 %1026  ;;  %v3196_v28 = vsel %vm483_vm3, %v560_v0, 2147483647 }
 0x19a   : > { %v3132_v32 = vsel %vm982_vm2, %v1056_v60, 2147483647  ;;  %4474 = vst [vmem:[#allocation44_spill] sm:$0xff] %v3182_v35  ;;  %vm1045_vm12 = vcmp.ge.f32.partialorder %v2929_v52, %v3182_v35 }
 0x19b   : > { %v3128_v14 = vpop.xlane.xlu1 %999  ;;  %661 = vmin.xlane.f32.xlu1 %v3126_v11  ;;  %v1172_v55 = vshra.s32 %v3132_v32, 16  ;;  %v1063_v35 = vsel %vm1045_vm12, %v2980_v18, 16 }
 0x19c   : > { %4470 = vst [vmem:[#allocation40_spill] sm:$0xff] %v3128_v14  ;;  %vm1036_vm5 = vcmp.ge.f32.partialorder %v2934_v54, %v3128_v14 }
 0x19d   : > { %v1054_v10 = vsel %vm1036_vm5, %v2980_v18, 16  ;;  %v3147_v7 = vcvt.s32.f32 %v1172_v55  ;;  %v3165_v55 = vcvt.s32.f32 %v628_v49  ;;  %v3214_v27 = vpop.xlane.xlu0 %527 }
 0x19e   : > { %v3156_v1 = vsel %vm982_vm2, %v1054_v10, 2147483647  ;;  %4477 = vst [vmem:[#allocation47_spill] sm:$0xff] %v3214_v27  ;;  %vm548_vm14 = vcmp.ge.f32.partialorder %v2929_v52, %v3214_v27 }
 0x19f   : > { %v3149_v60 = vpop.xlane.xlu1 %500  ;;  %1130 = vmin.xlane.f32.xlu1 %v3145_v31  ;;  %1175 = vmin.xlane.f32.xlu0 %v3147_v7  ;;  %v1142_v10 = vshra.s32 %v3156_v1, 16  ;;  %v564_v27 = vsel %vm548_vm14, %v2844_v5, 16 }
 0x1a0   : > { %4471 = vst [vmem:[#allocation41_spill] sm:$0xff] %v3149_v60  ;;  %vm539_vm6 = vcmp.ge.f32.partialorder %v2934_v54, %v3149_v60 }
 0x1a1   : > { %v555_v16 = vsel %vm539_vm6, %v2844_v5, 16  ;;  %v3184_v50 = vcvt.s32.f32 %v1142_v10  ;;  %v3242_v17 = vpop.xlane.xlu0 %521 }
 0x1a2   : > { %v3173_v60 = vsel %vm483_vm3, %v555_v16, 2147483647  ;;  %4479 = vst [vmem:[#allocation49_spill] sm:$0xff] %v3242_v17  ;;  %vm546_vm5 = vcmp.ge.f32.partialorder %v2943_v59, %v3242_v17 }
 0x1a3   : > { %v3169_v33 = vpop.xlane.xlu1 %1014  ;;  %631 = vmin.xlane.f32.xlu1 %v3165_v55  ;;  %676 = vmin.xlane.f32.xlu0 %v3167_v58  ;;  %v643_v38 = vshra.s32 %v3173_v60, 16  ;;  %v562_v17 = vsel %vm546_vm5, %v2844_v5, 16 }
 0x1a4   : > { %4473 = vst [vmem:[#allocation43_spill] sm:$0xff] %v3169_v33  ;;  %vm1041_vm8 = vcmp.ge.f32.partialorder %v2908_v40, %v3169_v33 }
 0x1a5   : > { %v1059_v49 = vsel %vm1041_vm8, %v2980_v18, 16  ;;  %v3186_v54 = vcvt.s32.f32 %v643_v38  ;;  %v3278_v53 = vpop.xlane.xlu0 %530 }
 0x1a6   : > { %v3191_v14 = vsel %vm982_vm2, %v1059_v49, 2147483647  ;;  %v718_v49 = vshra.s32 %v3196_v28, 16  ;;  %4482 = vst [vmem:[#allocation52_spill] sm:$0xff] %v3278_v53  ;;  %vm549_vm6 = vcmp.ge.f32.partialorder %v2950_v63, %v3278_v53 }
 0x1a7   : > { %v3188_v16 = vpop.xlane.xlu1 %1008  ;;  %1145 = vmin.xlane.f32.xlu1 %v3184_v50  ;;  %646 = vmin.xlane.f32.xlu0 %v3186_v54  ;;  %v1217_v10 = vshra.s32 %v3191_v14, 16 }
 0x1a8   : > { %4475 = vst [vmem:[#allocation45_spill] sm:$0xff] %v3188_v16  ;;  %vm1039_vm9 = vcmp.ge.f32.partialorder %v2955_v3, %v3188_v16  ;;  %v3220_v40 = vcvt.s32.f32 %v718_v49 }
 0x1a9   : > { %v1057_v38 = vsel %vm1039_vm9, %v2980_v18, 16  ;;  %v3202_v42 = vcvt.s32.f32 %v1217_v10 }
 0x1aa   : > { %v3212_v0 = vsel %vm982_vm2, %v1057_v38, 2147483647 }
 0x1ab   : > { %v3204_v22 = vpop.xlane.xlu1 %509  ;;  %1220 = vmin.xlane.f32.xlu1 %v3202_v42  ;;  %v1187_v4 = vshra.s32 %v3212_v0, 16 }
 0x1ac   : > { %4476 = vst [vmem:[#allocation46_spill] sm:$0xff] %v3204_v22  ;;  %vm542_vm11 = vcmp.ge.f32.partialorder %v2955_v3, %v3204_v22  ;;  %v561_v22 = vsel %vm545_vm10, %v2844_v5, 16 }
 0x1ad   : > { %v558_v10 = vsel %vm542_vm11, %v2844_v5, 16  ;;  %v3240_v16 = vsel %vm483_vm3, %v561_v22, 2147483647 }
 0x1ae   : > { %v3229_v38 = vsel %vm483_vm3, %v558_v10, 2147483647 }
 0x1af   : > { %v3222_v33 = vpop.xlane.xlu1 %1017  ;;  %721 = vmin.xlane.f32.xlu1 %v3220_v40 }
 0x1b0   : > { %4478 = vst [vmem:[#allocation48_spill] sm:$0xff] %v3222_v33  ;;  %vm1042_vm13 = vcmp.ge.f32.partialorder %v2915_v44, %v3222_v33  ;;  %v3244_v44 = vcvt.s32.f32 %v1187_v4  ;;  %v688_v33 = vshra.s32 %v3229_v38, 16  ;;  %v733_v4 = vshra.s32 %v3240_v16, 16 }
 0x1b1   : > { %v1060_v3 = vsel %vm1042_vm13, %v2980_v18, 16 }
 0x1b2   : > { %v3237_v49 = vsel %vm982_vm2, %v1060_v3, 2147483647  ;;  %v3255_v3 = vsel %vm982_vm2, %v1063_v35, 2147483647  ;;  %v3266_v24 = vcvt.s32.f32 %v688_v33 }
 0x1b3   : > { %v3246_v10 = vpop.xlane.xlu1 %1011  ;;  %v1232_v20 = vshra.s32 %v3237_v49, 16  ;;  %1190 = vmin.xlane.f32.xlu1 %v3244_v44  ;;  %v1277_v35 = vshra.s32 %v3255_v3, 16 }
 0x1b4   : > { %4480 = vst [vmem:[#allocation50_spill] sm:$0xff] %v3246_v10  ;;  %vm1040_vm0 = vcmp.ge.f32.partialorder %v2922_v48, %v3246_v10  ;;  %v3276_v10 = vsel %vm483_vm3, %v564_v27, 2147483647 }
 0x1b5   : > { %v3258_v22 = vcvt.s32.f32 %v1232_v20  ;;  %v1058_v52 = vsel %vm1040_vm0, %v2980_v18, 16  ;;  %v559_v20 = vsel %vm543_vm15, %v2844_v5, 16  ;;  %v778_v15 = vshra.s32 %v3276_v10, 16 }
 0x1b6   : > { %v3264_v30 = vsel %vm982_vm2, %v1058_v52, 2147483647  ;;  %v3281_v52 = vcvt.s32.f32 %v733_v4  ;;  %v3288_v39 = vsel %vm483_vm3, %v559_v20, 2147483647 }
 0x1b7   : > { %1235 = vmin.xlane.f32.xlu0 %v3258_v22  ;;  %v3269_v48 = vpop.xlane.xlu1 %1020  ;;  %691 = vmin.xlane.f32.xlu1 %v3266_v24  ;;  %v1202_v33 = vshra.s32 %v3264_v30, 16  ;;  %4483 = vst [vmem:[#allocation53_spill] sm:$0xff] %v3288_v39  ;;  %v3312_v53 = vcvt.s32.f32 %v778_v15 }
 0x1b8   : > { %4481 = vst [vmem:[#allocation51_spill] sm:$0xff] %v3269_v48  ;;  %vm1043_vm4 = vcmp.ge.f32.partialorder %v2943_v59, %v3269_v48  ;;  %v3290_v48 = vcvt.s32.f32 %v1277_v35  ;;  %v703_v35 = vshra.s32 %v3288_v39, 16  ;;  %v3324_v39 = vpop.xlane.xlu0 %524 }
 0x1b9   : > { %v1061_v25 = vsel %vm1043_vm4, %v2980_v18, 16  ;;  %v3304_v20 = vcvt.s32.f32 %v1202_v33  ;;  %4488 = vst [vmem:[#allocation58_spill] sm:$0xff] %v3312_v53  ;;  %v565_v33 = vsel %vm549_vm6, %v2844_v5, 16  ;;  %4491 = vst [vmem:[#allocation61_spill] sm:$0xff] %v3324_v39  ;;  %vm547_vm9 = vcmp.ge.f32.partialorder %v2960_v6, %v3324_v39 }
 0x1ba   : > { %v3301_v4 = vsel %vm982_vm2, %v1061_v25, 2147483647  ;;  %v3327_v15 = vcvt.s32.f32 %v703_v35 }
 0x1bb   : > { %736 = vmin.xlane.f32.xlu0 %v3281_v52  ;;  %v3293_v27 = vpop.xlane.xlu1 %1029  ;;  %4485 = vst [vmem:[#allocation55_spill] sm:$0xff] %v3301_v4  ;;  %1280 = vmin.xlane.f32.xlu1 %v3290_v48  ;;  %4486 = vst [vmem:[#allocation56_spill] sm:$0xff] %v3304_v20  ;;  %v1247_v25 = vshra.s32 %v3301_v4, 16 }
 0x1bc   : > { %4484 = vst [vmem:[#allocation54_spill] sm:$0xff] %v3293_v27  ;;  %vm1046_vm7 = vcmp.ge.f32.partialorder %v2950_v63, %v3293_v27  ;;  %v3322_v27 = vsel %vm483_vm3, %v562_v17, 2147483647 }
 0x1bd   : > { %v1064_v59 = vsel %vm1046_vm7, %v2980_v18, 16  ;;  %4490 = vst [vmem:[#allocation60_spill] sm:$0xff] %v3322_v27  ;;  %v3334_v4 = vcvt.s32.f32 %v1247_v25  ;;  %v563_v25 = vsel %vm547_vm9, %v2844_v5, 16 }
 0x1be   : > { %v3310_v19 = vsel %vm982_vm2, %v1064_v59, 2147483647 }
 0x1bf   : > { %4487 = vst [vmem:[#allocation57_spill] sm:$0xff] %v3310_v19  ;;  %1205 = vmin.xlane.f32.xlu0 %v3304_v20  ;;  %v3315_v63 = vpop.xlane.xlu1 %1023  ;;  %781 = vmin.xlane.f32.xlu1 %v3312_v53  ;;  %v1292_v59 = vshra.s32 %v3310_v19, 16  ;;  %v3331_v20 = vsel %vm483_vm3, %v565_v33, 2147483647 }
 0x1c0   : > { %4489 = vst [vmem:[#allocation59_spill] sm:$0xff] %v3315_v63  ;;  %vm1044_vm8 = vcmp.ge.f32.partialorder %v2960_v6, %v3315_v63  ;;  %v748_v63 = vshra.s32 %v3322_v27, 16  ;;  %v793_v19 = vshra.s32 %v3331_v20, 16 }
 0x1c1   : > { %v1062_v17 = vsel %vm1044_vm8, %v2980_v18, 16  ;;  %v3341_v35 = vcvt.s32.f32 %v1292_v59  ;;  %v3356_v59 = vsel %vm483_vm3, %v563_v25, 2147483647 }
 0x1c2   : > { %v3345_v33 = vsel %vm982_vm2, %v1062_v17, 2147483647  ;;  %v3347_v53 = vcvt.s32.f32 %v748_v63  ;;  %v3352_v18 = vcvt.s32.f32 %v793_v19  ;;  %4493 = vst [vmem:[#allocation63_spill] sm:$0xff] %v3356_v59  ;;  %v763_v63 = vshra.s32 %v3356_v59, 16 }
 0x1c3   : > { %706 = vmin.xlane.f32.xlu0 %v3327_v15  ;;  %1250 = vmin.xlane.f32.xlu1 %v3334_v4  ;;  %v1262_v39 = vshra.s32 %v3345_v33, 16  ;;  %v1096_v19 = vand.u32 65535, %v2992_v23 }
 0x1c4   : > { %4492 = vst [vmem:[#allocation62_spill] sm:$0xff] %v3347_v53  ;;  %v3363_v17 = vcvt.s32.f32 %v763_v63  ;;  %v1066_v63 = vand.u32 65535, %v3014_v36  ;;  %v1111_v36 = vand.u32 65535, %v3042_v51 }
 0x1c5   : > { %v3359_v6 = vcvt.s32.f32 %v1262_v39  ;;  %v1098_v27 = vcvt.s32.f32 %v1096_v19  ;;  %v597_v39 = vand.u32 65535, %v3009_v34 }
 0x1c6   : > { %4495 = vst [vmem:[#allocation65_spill] sm:$0xff] %v3363_v17  ;;  %v1068_v19 = vcvt.s32.f32 %v1066_v63 }
 0x1c7   : > { %1295 = vmin.xlane.f32.xlu0 %v3341_v35  ;;  %751 = vmin.xlane.f32.xlu1 %v3347_v53  ;;  %4494 = vst [vmem:[#allocation64_spill] sm:$0xff] %v3359_v6  ;;  %v599_v59 = vcvt.s32.f32 %v597_v39  ;;  %v1156_v39 = vand.u32 65535, %v3083_v13 }
 0x1cb   : > { %796 = vmin.xlane.f32.xlu0 %v3352_v18 }
 0x1cf   : > { %1265 = vmin.xlane.f32.xlu0 %v3359_v6  ;;  %v567_v6 = vand.u32 65535, %v3028_v45  ;;  %v1113_v45 = vcvt.s32.f32 %v1111_v36 }
 0x1d3   : > { %766 = vmin.xlane.f32.xlu0 %v3363_v17 }
 0x208   : > { %v3367_v53 = vpop.xlane.xlu1 %1100 }
 0x209   : > { %vm1102_vm2 = vcmp.eq.f32.partialorder %v3001_v29, %v3367_v53 }
 0x20a   : > { %v1103_v25 = vsel %vm1102_vm2, %v1098_v27, inf  ;;  %v569_v27 = vcvt.s32.f32 %v567_v6 }
 0x20b   : > { %1104 = vmin.xlane.f32.xlu1 %v1103_v25  ;;  %v612_v25 = vand.u32 65535, %v3057_v61 }
 0x20c   : > { %v3372_v5 = vpop.xlane.xlu1 %601 }
 0x20d   : > { %vm603_vm10 = vcmp.eq.f32.partialorder %v3020_v41, %v3372_v5  ;;  %v614_v51 = vcvt.s32.f32 %v612_v25 }
 0x20e   : > { %v604_v17 = vsel %vm603_vm10, %v599_v59, inf }
 0x20f   : > { %605 = vmin.xlane.f32.xlu1 %v604_v17 }
 0x210   : > { %v3377_v23 = vpop.xlane.xlu1 %1070 }
 0x211   : > { %vm1072_vm11 = vcmp.eq.f32.partialorder %v3034_v47, %v3377_v23 }
 0x212   : > { %v1073_v29 = vsel %vm1072_vm11, %v1068_v19, inf }
 0x213   : > { %1074 = vmin.xlane.f32.xlu1 %v1073_v29  ;;  %v1158_v29 = vcvt.s32.f32 %v1156_v39  ;;  %v627_v39 = vand.u32 65535, %v3137_v43 }
 0x214   : > { %v3382_v34 = vpop.xlane.xlu1 %571 }
 0x215   : > { %vm573_vm12 = vcmp.eq.f32.partialorder %v3051_v57, %v3382_v34  ;;  %v1081_v57 = vand.u32 65535, %v3062_v62 }
 0x216   : > { %v574_v41 = vsel %vm573_vm12, %v569_v27, inf  ;;  %v657_v27 = vand.u32 65535, %v3099_v37 }
 0x217   : > { %575 = vmin.xlane.f32.xlu1 %v574_v41  ;;  %v1083_v19 = vcvt.s32.f32 %v1081_v57  ;;  %v672_v57 = vand.u32 65535, %v3140_v2  ;;  %v1141_v2 = vand.u32 65535, %v3156_v1 }
 0x218   : > { %v3387_v59 = vpop.xlane.xlu0 %616  ;;  %v3389_v17 = vpop.xlane.xlu1 %1115  ;;  %v659_v41 = vcvt.s32.f32 %v657_v27 }
 0x219   : > { %vm1117_vm13 = vcmp.eq.f32.partialorder %v3070_v8, %v3389_v17  ;;  %vm618_vm14 = vcmp.eq.f32.partialorder %v3072_v9, %v3387_v59  ;;  %v582_v9 = vand.u32 65535, %v3078_v12  ;;  %v1126_v12 = vand.u32 65535, %v3118_v56 }
 0x21a   : > { %v1118_v47 = vsel %vm1117_vm13, %v1113_v45, inf  ;;  %v619_v63 = vsel %vm618_vm14, %v614_v51, inf  ;;  %v1171_v45 = vand.u32 65535, %v3132_v32  ;;  %v1143_v27 = vcvt.s32.f32 %v1141_v2 }
 0x21b   : > { %1119 = vmin.xlane.f32.xlu0 %v1118_v47  ;;  %v584_v36 = vcvt.s32.f32 %v582_v9  ;;  %v1128_v51 = vcvt.s32.f32 %v1126_v12  ;;  %v1186_v12 = vand.u32 65535, %v3212_v0  ;;  %v732_v0 = vand.u32 65535, %v3240_v16 }
 0x21c   : > { %v3396_v6 = vpop.xlane.xlu1 %1085  ;;  %v3402_v61 = vpop.xlane.xlu0 %586  ;;  %v1201_v16 = vand.u32 65535, %v3264_v30 }
 0x21d   : > { %vm1087_vm15 = vcmp.eq.f32.partialorder %v3091_v21, %v3396_v6  ;;  %vm588_vm4 = vcmp.eq.f32.partialorder %v3093_v26, %v3402_v61  ;;  %v1173_v26 = vcvt.s32.f32 %v1171_v45 }
 0x21e   : > { %v1088_v62 = vsel %vm1087_vm15, %v1083_v19, inf  ;;  %v589_v37 = vsel %vm588_vm4, %v584_v36, inf  ;;  %v674_v19 = vcvt.s32.f32 %v672_v57 }
 0x21f   : > { %620 = vmin.xlane.f32.xlu0 %v619_v63 }
 0x220   : > { %v3404_v8 = vpop.xlane.xlu1 %1160 }
 0x221   : > { %vm1162_vm0 = vcmp.eq.f32.partialorder %v3110_v46, %v3404_v8 }
 0x222   : > { %v1163_v13 = vsel %vm1162_vm0, %v1158_v29, inf  ;;  %v629_v29 = vcvt.s32.f32 %v627_v39 }
 0x223   : > { %1089 = vmin.xlane.f32.xlu0 %v1088_v62  ;;  %1164 = vmin.xlane.f32.xlu1 %v1163_v13  ;;  %v642_v62 = vand.u32 65535, %v3173_v60  ;;  %v1216_v13 = vand.u32 65535, %v3191_v14 }
 0x224   : > { %v3412_v21 = vpop.xlane.xlu1 %661 }
 0x225   : > { %vm663_vm5 = vcmp.eq.f32.partialorder %v3126_v11, %v3412_v21  ;;  %v1218_v36 = vcvt.s32.f32 %v1216_v13 }
 0x226   : > { %v664_v46 = vsel %vm663_vm5, %v659_v41, inf  ;;  %v717_v41 = vand.u32 65535, %v3196_v28 }
 0x227   : > { %590 = vmin.xlane.f32.xlu0 %v589_v37  ;;  %665 = vmin.xlane.f32.xlu1 %v664_v46  ;;  %v1231_v37 = vand.u32 65535, %v3237_v49  ;;  %v1188_v46 = vcvt.s32.f32 %v1186_v12 }
 0x228   : > { %v3418_v25 = vpop.xlane.xlu0 %1175  ;;  %v3420_v47 = vpop.xlane.xlu1 %1130 }
 0x229   : > { %vm1177_vm6 = vcmp.eq.f32.partialorder %v3147_v7, %v3418_v25  ;;  %vm1132_vm7 = vcmp.eq.f32.partialorder %v3145_v31, %v3420_v47  ;;  %v1233_v57 = vcvt.s32.f32 %v1231_v37 }
 0x22a   : > { %v1178_v56 = vsel %vm1177_vm6, %v1173_v26, inf  ;;  %v1133_v11 = vsel %vm1132_vm7, %v1128_v51, inf }
 0x22b   : > { %1179 = vmin.xlane.f32.xlu0 %v1178_v56  ;;  %1134 = vmin.xlane.f32.xlu1 %v1133_v11  ;;  %v734_v11 = vcvt.s32.f32 %v732_v0  ;;  %v1261_v0 = vand.u32 65535, %v3345_v33 }
 0x22c   : > { %v3428_v32 = vpop.xlane.xlu0 %676  ;;  %v3430_v63 = vpop.xlane.xlu1 %631 }
 0x22d   : > { %vm678_vm8 = vcmp.eq.f32.partialorder %v3167_v58, %v3428_v32  ;;  %vm633_vm9 = vcmp.eq.f32.partialorder %v3165_v55, %v3430_v63  ;;  %v644_v55 = vcvt.s32.f32 %v642_v62 }
 0x22e   : > { %v679_v7 = vsel %vm678_vm8, %v674_v19, inf  ;;  %v634_v31 = vsel %vm633_vm9, %v629_v29, inf  ;;  %v777_v29 = vand.u32 65535, %v3276_v10 }
 0x22f   : > { %680 = vmin.xlane.f32.xlu0 %v679_v7  ;;  %635 = vmin.xlane.f32.xlu1 %v634_v31  ;;  %v1203_v7 = vcvt.s32.f32 %v1201_v16  ;;  %v4496_v31 = vld [vmem:[#allocation53_spill] sm:$0xff]  ;;  %v1107_v16 = vcvt.f32.s32 %v3367_v53  ;;  %v4505_v53 = vld [vmem:[#allocation7_spill] sm:$0xff] }
 0x230   : > { %v3437_v43 = vpop.xlane.xlu0 %646  ;;  %v3439_v9 = vpop.xlane.xlu1 %1145  ;;  %v702_v30 = vand.u32 65535, %v4496_v31  ;;  %v779_v10 = vcvt.s32.f32 %v777_v29  ;;  %v1122_v29 = vcvt.f32.s32 %v3389_v17 }
 0x231   : > { %vm1147_vm2 = vcmp.eq.f32.partialorder %v3184_v50, %v3439_v9  ;;  %vm648_vm10 = vcmp.eq.f32.partialorder %v3186_v54, %v3437_v43  ;;  %v719_v50 = vcvt.s32.f32 %v717_v41  ;;  %v4500_v41 = vld [vmem:[#allocation57_spill] sm:$0xff] }
 0x232   : > { %v1148_v58 = vsel %vm1147_vm2, %v1143_v27, inf  ;;  %v649_v60 = vsel %vm648_vm10, %v644_v55, inf  ;;  %v4497_v27 = vld [vmem:[#allocation56_spill] sm:$0xff] }
 0x233   : > { %1149 = vmin.xlane.f32.xlu0 %v1148_v58 }
 0x234   : > { %v3447_v1 = vpop.xlane.xlu1 %1220 }
 0x235   : > { %vm1222_vm11 = vcmp.eq.f32.partialorder %v3202_v42, %v3447_v1  ;;  %v687_v42 = vand.u32 65535, %v3229_v38 }
 0x236   : > { %v1223_v45 = vsel %vm1222_vm11, %v1218_v36, inf  ;;  %v704_v36 = vcvt.s32.f32 %v702_v30  ;;  %v1077_v30 = vcvt.f32.s32 %v3377_v23 }
 0x237   : > { %650 = vmin.xlane.f32.xlu0 %v649_v60  ;;  %1224 = vmin.xlane.f32.xlu1 %v1223_v45  ;;  %v689_v56 = vcvt.s32.f32 %v687_v42  ;;  %v1291_v60 = vand.u32 65535, %v4500_v41  ;;  %v4407_v41 = vmov 0.0  }
 0x238   : > { %v3452_v14 = vpop.xlane.xlu1 %721  ;;  %v1078_v17 = vshll.u32 %v1077_v30, 16 }
 0x239   : > { %vm723_vm12 = vcmp.eq.f32.partialorder %v3220_v40, %v3452_v14  ;;  %v1276_v40 = vand.u32 65535, %v3255_v3  ;;  %v1293_v42 = vcvt.s32.f32 %v1291_v60 }
 0x23a   : > { %v724_v54 = vsel %vm723_vm12, %v719_v50, inf }
 0x23b   : > { %725 = vmin.xlane.f32.xlu0 %v724_v54  ;;  %v1278_v19 = vcvt.s32.f32 %v1276_v40 }
 0x23c   : > { %v3458_v28 = vpop.xlane.xlu1 %1190 }
 0x23d   : > { %vm1192_vm13 = vcmp.eq.f32.partialorder %v3244_v44, %v3458_v28 }
 0x23e   : > { %v1193_v26 = vsel %vm1192_vm13, %v1188_v46, inf }
 0x23f   : > { %1194 = vmin.xlane.f32.xlu1 %v1193_v26  ;;  %v792_v26 = vand.u32 65535, %v3331_v20  ;;  %v4502_v20 = vld [vmem:[#allocation64_spill] sm:$0xff] }
 0x240   : > { %v3463_v51 = vpop.xlane.xlu0 %1235  ;;  %v3469_v49 = vpop.xlane.xlu1 %691 }
 0x241   : > { %vm1237_vm14 = vcmp.eq.f32.partialorder %v3258_v22, %v3463_v51  ;;  %vm693_vm15 = vcmp.eq.f32.partialorder %v3266_v24, %v3469_v49  ;;  %v794_v40 = vcvt.s32.f32 %v792_v26  ;;  %v1759_v26 = vld [vmem:[%s4324_s3 + $0x8] sm:$0xff] }
 0x242   : > { %v1238_v39 = vsel %vm1237_vm14, %v1233_v57, inf  ;;  %v694_v44 = vsel %vm693_vm15, %v689_v56, inf  ;;  %v1263_v56 = vcvt.s32.f32 %v1261_v0 }
 0x243   : > { %1239 = vmin.xlane.f32.xlu0 %v1238_v39  ;;  %695 = vmin.xlane.f32.xlu1 %v694_v44 }
 0x244   : > { %v3473_v38 = vpop.xlane.xlu0 %736  ;;  %v3478_v22 = vpop.xlane.xlu1 %1280 }
 0x245   : > { %vm738_vm0 = vcmp.eq.f32.partialorder %v3281_v52, %v3473_v38  ;;  %vm1282_vm4 = vcmp.eq.f32.partialorder %v3290_v48, %v3478_v22  ;;  %v4498_v52 = vld [vmem:[#allocation55_spill] sm:$0xff]  ;;  %v4499_v48 = vld [vmem:[#allocation58_spill] sm:$0xff] }
 0x246   : > { %v739_v3 = vsel %vm738_vm0, %v734_v11, inf  ;;  %v1283_v24 = vsel %vm1282_vm4, %v1278_v19, inf  ;;  %v1246_v62 = vand.u32 65535, %v4498_v52 }
 0x247   : > { %740 = vmin.xlane.f32.xlu0 %v739_v3  ;;  %1284 = vmin.xlane.f32.xlu1 %v1283_v24 }
 0x248   : > { %v3483_v2 = vpop.xlane.xlu0 %1205  ;;  %v3489_v13 = vpop.xlane.xlu1 %781  ;;  %v1248_v54 = vcvt.s32.f32 %v1246_v62  ;;  %v1761_v62 = vld [vmem:[%s4324_s3 + $0x18] sm:$0xff] }
 0x249   : > { %vm1207_vm5 = vcmp.eq.f32.partialorder %v4497_v27, %v3483_v2  ;;  %vm783_vm6 = vcmp.eq.f32.partialorder %v4499_v48, %v3489_v13  ;;  %v1123_v27 = vshll.u32 %v1122_v29, 16  ;;  %2331 = vmatprep.subr.mxu1 %v1761_v62 }
 0x24a   : > { %v1208_v58 = vsel %vm1207_vm5, %v1203_v7, inf  ;;  %v3496_v45 = vsel %vm783_vm6, %v779_v10, inf  ;;  %2332 = vmatpush3.msra.mxu1 %v1761_v62  ;;  %v4507_v62 = vld [vmem:[#allocation63_spill] sm:$0xff] }
 0x24b   : > { %1209 = vmin.xlane.f32.xlu0 %v1208_v58 }
 0x24c   : > { %v3493_v55 = vpop.xlane.xlu0 %706  ;;  %v3500_v50 = vpop.xlane.xlu1 %1250 }
 0x24d   : > { %vm708_vm7 = vcmp.eq.f32.partialorder %v3327_v15, %v3493_v55  ;;  %vm1252_vm8 = vcmp.eq.f32.partialorder %v3334_v4, %v3500_v50 }
 0x24e   : > { %v709_v12 = vsel %vm708_vm7, %v704_v36, inf  ;;  %v1253_v37 = vsel %vm1252_vm8, %v1248_v54, inf  ;;  %v1092_v36 = vcvt.f32.s32 %v3396_v6 }
 0x24f   : > { %710 = vmin.xlane.f32.xlu0 %v709_v12  ;;  %1254 = vmin.xlane.f32.xlu1 %v1253_v37 }
 0x250   : > { %v3504_v46 = vpop.xlane.xlu0 %1295 }
 0x251   : > { %vm1297_vm9 = vcmp.eq.f32.partialorder %v3341_v35, %v3504_v46  ;;  %v3520_v35 = vpop.xlane.xlu1 %751 }
 0x252   : > { %v1298_v57 = vsel %vm1297_vm9, %v1293_v42, inf  ;;  %4503 = vst [vmem:[#allocation56_spill] sm:$0xff] %v3520_v35  ;;  %v1760_v42 = vld [vmem:[%s4324_s3 + $0x10] sm:$0xff] }
 0x253   : > { %1299 = vmin.xlane.f32.xlu0 %v1298_v57  ;;  %2333 = vmatprep.subr.mxu1 %v1760_v42  ;;  %v1093_v57 = vshll.u32 %v1092_v36, 16  ;;  %v4509_v36 = vld [vmem:[#allocation65_spill] sm:$0xff] }
 0x254   : > { %v3509_v15 = vpop.xlane.xlu0 %796  ;;  %2334 = vmatpush3.msra.mxu1 %v1760_v42  ;;  %v4510_v42 = vld [vmem:[#allocation24_spill] sm:$0xff] }
 0x255   : > { %4501 = vst [vmem:[#allocation53_spill] sm:$0xff] %v3509_v15  ;;  %vm798_vm2 = vcmp.eq.f32.partialorder %v3352_v18, %v3509_v15  ;;  %v1108_v18 = vshll.u32 %v1107_v16, 16  ;;  %2335 = vmatprep.subr.mxu1 %v1759_v26 }
 0x256   : > { %v3514_v4 = vsel %vm798_vm2, %v794_v40, inf  ;;  %v1758_v40 = vld [vmem:[%s4324_s3] sm:$0xff]  ;;  %2336 = vmatpush3.msra.mxu1 %v1759_v26  ;;  %v4511_v26 = vld [vmem:[#allocation8_spill] sm:$0xff] }
 0x257   : > { %2337 = vmatprep.subr.mxu1 %v1758_v40 }
 0x258   : > { %v3516_v39 = vpop.xlane.xlu0 %1265  ;;  %2338 = vmatpush3.msra.mxu1 %v1758_v40  ;;  %v4513_v40 = vld [vmem:[#allocation11_spill] sm:$0xff] }
 0x259   : > { %vm1267_vm10 = vcmp.eq.f32.partialorder %v4502_v20, %v3516_v39 }
 0x25a   : > { %v1268_v44 = vsel %vm1267_vm10, %v1263_v56, inf }
 0x25b   : > { %1269 = vmin.xlane.f32.xlu0 %v1268_v44 }
 0x25c   : > { %v3525_v19 = vpop.xlane.xlu0 %766 }
 0x25d   : > { %4504 = vst [vmem:[#allocation55_spill] sm:$0xff] %v3525_v19  ;;  %vm768_vm15 = vcmp.eq.f32.partialorder %v4509_v36, %v3525_v19  ;;  %v4518_v19 = vld [vmem:[#allocation60_spill] sm:$0xff] }
 0x294   : > { %v1105_v11 = vpop.xlane.xlu1 %1104 }
 0x295   : > { %v1106_v3 = vcvt.f32.s32 %v1105_v11 }
 0x297   : > { %v1109_v24 = vadd.s32 %v1108_v18, %v1106_v3 }
 0x298   : > { %v3523_v33 = vpop.xlane.xlu1 %605 }
 0x299   : > { %vm1307_vm11 = vcmp.eq.s32.totalorder %v4505_v53, %v1109_v24 }
 0x29a   : > { %v2229_v60 = vsel %vm1307_vm11, 1.0, %v4407_v41 }
 0x29c   : > { %v1075_v7 = vpop.xlane.xlu1 %1074 }
 0x29d   : > { %v1076_v58 = vcvt.f32.s32 %v1075_v7 }
 0x29f   : > { %v1079_v54 = vadd.s32 %v1078_v17, %v1076_v58  ;;  %v762_v58 = vand.u32 65535, %v4507_v62 }
 0x2a0   : > { %v3537_v23 = vpop.xlane.xlu1 %575 }
 0x2a1   : > { %vm1305_vm13 = vcmp.eq.s32.totalorder %v4505_v53, %v1079_v54 }
 0x2a2   : > { %v2227_v11 = vsel %vm1305_vm13, 1.0, %v4407_v41 }
 0x2a4   : > { %v1120_v31 = vpop.xlane.xlu0 %1119 }
 0x2a5   : > { %v1121_v52 = vcvt.f32.s32 %v1120_v31 }
 0x2a7   : > { %v1124_v10 = vadd.s32 %v1123_v27, %v1121_v52 }
 0x2a8   : > { %v3533_v48 = vpop.xlane.xlu0 %620 }
 0x2a9   : > { %vm1308_vm12 = vcmp.eq.s32.totalorder %v4505_v53, %v1124_v10 }
 0x2aa   : > { %v2230_v12 = vsel %vm1308_vm12, 1.0, %v4407_v41 }
 0x2ab   : > { %v2438_v37 = vpack.i.bf16 %v2230_v12, %v2229_v60  ;;  %v698_v60 = vcvt.f32.s32 %v3469_v49  ;;  %v764_v12 = vcvt.s32.f32 %v762_v58  ;;  %v4516_v49 = vld [vmem:[#allocation32_spill] sm:$0xff]  ;;  %v4517_v58 = vld [vmem:[#allocation13_spill] sm:$0xff] }
 0x2ac   : > { %v1090_v6 = vpop.xlane.xlu0 %1089  ;;  %v3551_v56 = vpop.xlane.xlu1 %1164 }
 0x2ad   : > { %v1091_v0 = vcvt.f32.s32 %v1090_v6  ;;  %2439 = vrot.lane.b32.xlu0 %v2438_v37, %s2711_s21  ;;  %v769_v37 = vsel %vm768_vm15, %v764_v12, inf  ;;  %v1355_v6 = vsub.f32 %v4511_v26, %v4510_v42  ;;  %v747_v42 = vand.u32 65535, %v4518_v19 }
 0x2ae   : > { %v1167_v19 = vcvt.f32.s32 %v3404_v8 }
 0x2af   : > { %v1094_v20 = vadd.s32 %v1093_v57, %v1091_v0  ;;  %v4512_v0 = vld [vmem:[#allocation29_spill] sm:$0xff]  ;;  %v1373_v36 = vmul.f32 1.442695, %v1355_v6 }
 0x2b0   : > { %v3554_v44 = vpop.xlane.xlu0 %590  ;;  %v3559_v18 = vpop.xlane.xlu1 %665  ;;  %v4519_v6 = vld [vmem:[#allocation25_spill] sm:$0xff] }
 0x2b1   : > { %vm1306_vm14 = vcmp.eq.s32.totalorder %v4505_v53, %v1094_v20  ;;  %v1359_v20 = vsub.f32 %v4513_v40, %v4512_v0  ;;  %v1287_v0 = vcvt.f32.s32 %v3478_v22  ;;  %2488 = vpow2.f32 %v1373_v36 }
 0x2b2   : > { %v2228_v16 = vsel %vm1306_vm14, 1.0, %v4407_v41  ;;  %v1357_v41 = vsub.f32 %v4517_v58, %v4516_v49  ;;  %v1182_v49 = vcvt.f32.s32 %v3418_v25  ;;  %v1152_v22 = vcvt.f32.s32 %v3439_v9 }
 0x2b3   : > { %v2443_v3 = vpack.i.bf16 %v2228_v16, %v2227_v11  ;;  %v699_v11 = vshll.u32 %v698_v60, 16  ;;  %v1381_v12 = vmul.f32 1.442695, %v1359_v20  ;;  %v713_v60 = vcvt.f32.s32 %v3493_v55 }
 0x2b4   : > { %v3561_v29 = vpop.xlane.xlu0 %1179  ;;  %v3566_v7 = vpop.xlane.xlu1 %1134  ;;  %v749_v55 = vcvt.s32.f32 %v747_v42  ;;  %v1288_v36 = vshll.u32 %v1287_v0, 16  ;;  %v1168_v42 = vshll.u32 %v1167_v19, 16  ;;  %v1183_v0 = vshll.u32 %v1182_v49, 16 }
 0x2b5   : > { %2444 = vrot.lane.b32.xlu1 %v2443_v3, %s2711_s21  ;;  %2490 = vpow2.f32 %v1381_v12  ;;  %v1137_v12 = vcvt.f32.s32 %v3420_v47 }
 0x2b7   : > { %v1138_v8 = vshll.u32 %v1137_v12, 16 }
 0x2b8   : > { %v3564_v24 = vpop.xlane.xlu0 %680  ;;  %v3570_v30 = vpop.xlane.xlu1 %635 }
 0x2bc   : > { %v3568_v31 = vpop.xlane.xlu0 %1149 }
 0x2bd   : > { %v1151_v25 = vcvt.f32.s32 %v3568_v31  ;;  %v1227_v31 = vcvt.f32.s32 %v3447_v1 }
 0x2c0   : > { %v3572_v27 = vpop.xlane.xlu0 %650  ;;  %v3574_v52 = vpop.xlane.xlu1 %1224 }
 0x2c1   : > { %4506 = vst [vmem:[#allocation58_spill] sm:$0xff] %v3572_v27  ;;  %v4523_v27 = vld [vmem:[#allocation22_spill] sm:$0xff] }
 0x2c4   : > { %v3577_v10 = vpop.xlane.xlu0 %725 }
 0x2c5   : > { %4508 = vst [vmem:[#allocation57_spill] sm:$0xff] %v3577_v10 }
 0x2c8   : > { %v3579_v17 = vpop.xlane.xlu1 %1194 }
 0x2cc   : > { %v3584_v54 = vpop.xlane.xlu0 %1239  ;;  %770 = vmin.xlane.f32.xlu0 %v769_v37  ;;  %v696_v57 = vpop.xlane.xlu1 %695 }
 0x2cd   : > { %v697_v16 = vcvt.f32.s32 %v696_v57  ;;  %v1377_v57 = vmul.f32 1.442695, %v1357_v41  ;;  %v714_v41 = vshll.u32 %v713_v60, 16  ;;  %v1153_v60 = vshll.u32 %v1152_v22, 16 }
 0x2ce   : > { %v1242_v22 = vcvt.f32.s32 %v3463_v51 }
 0x2cf   : > { %v3592_v62 = vadd.s32 %v699_v11, %v697_v16  ;;  %v4520_v11 = vld [vmem:[#allocation9_spill] sm:$0xff]  ;;  %2492 = vpow2.f32 %v1377_v57  ;;  %v1181_v16 = vcvt.f32.s32 %v3561_v29  ;;  %v1166_v29 = vcvt.f32.s32 %v3551_v56 }
 0x2d0   : > { %v3590_v3 = vpop.xlane.xlu0 %740  ;;  %785 = vmin.xlane.f32.xlu0 %v3496_v45  ;;  %v1285_v37 = vpop.xlane.xlu1 %1284  ;;  %v4521_v45 = vld [vmem:[#allocation62_spill] sm:$0xff] }
 0x2d1   : > { %4514 = vst [vmem:[#allocation64_spill] sm:$0xff] %v3590_v3  ;;  %4515 = vst [vmem:[#allocation7_spill] sm:$0xff] %v3592_v62  ;;  %vm753_vm0 = vcmp.eq.f32.partialorder %v4521_v45, %v3520_v35  ;;  %v1286_v20 = vcvt.f32.s32 %v1285_v37  ;;  %v4522_v37 = vld [vmem:[#allocation45_spill] sm:$0xff] }
 0x2d2   : > { %v754_v45 = vsel %vm753_vm0, %v749_v55, inf  ;;  %v1136_v55 = vcvt.f32.s32 %v3566_v7  ;;  %v1272_v7 = vcvt.f32.s32 %v3516_v39 }
 0x2d3   : > { %v1289_v15 = vadd.s32 %v1288_v36, %v1286_v20  ;;  %v1184_v20 = vadd.s32 %v1183_v0, %v1181_v16  ;;  %v1154_v36 = vadd.s32 %v1153_v60, %v1151_v25  ;;  %v4524_v16 = vmov 0.0  }
 0x2d4   : > { %v3598_v10 = vpop.xlane.xlu0 %1209  ;;  %800 = vmin.xlane.f32.xlu0 %v3514_v4  ;;  %v1302_v4 = vcvt.f32.s32 %v3504_v46  ;;  %v1257_v46 = vcvt.f32.s32 %v3500_v50  ;;  %v1197_v50 = vcvt.f32.s32 %v3458_v28  ;;  %v1139_v12 = vadd.s32 %v1138_v8, %v1136_v55  ;;  %v3636_v28 = vpop.eup %2488  ;;  %v4527_v55 = vld [vmem:[#allocation15_spill] sm:$0xff] }
 0x2d5   : > { %vm1319_vm4 = vcmp.eq.s32.totalorder %v4505_v53, %v1289_v15  ;;  %v1211_v56 = vcvt.f32.s32 %v3598_v10  ;;  %vm1312_vm6 = vcmp.eq.s32.totalorder %v4505_v53, %v1184_v20  ;;  %vm1310_vm7 = vcmp.eq.s32.totalorder %v4505_v53, %v1154_v36  ;;  %v3642_v10 = vpop.eup %2490 }
 0x2d6   : > { %v1303_v47 = vshll.u32 %v1302_v4, 16  ;;  %v1169_v4 = vadd.s32 %v1168_v42, %v1166_v29  ;;  %v3631_v15 = vsel %vm1319_vm4, 1.0, %v4524_v16  ;;  %4525 = vst [vmem:[#allocation63_spill] sm:$0xff] %v3642_v10  ;;  %v1241_v8 = vcvt.f32.s32 %v3584_v54  ;;  %v4526_v54 = vld [vmem:[#allocation43_spill] sm:$0xff] }
 0x2d7   : > { %v1273_v0 = vshll.u32 %v1272_v7, 16  ;;  %vm1309_vm9 = vcmp.eq.s32.totalorder %v4505_v53, %v1139_v12  ;;  %v1228_v36 = vshll.u32 %v1227_v31, 16  ;;  %v4528_v20 = vsub.f32 %v4523_v27, %v4522_v37 }
 0x2d8   : > { %v711_v62 = vpop.xlane.xlu0 %710  ;;  %vm1311_vm8 = vcmp.eq.s32.totalorder %v4505_v53, %v1169_v4  ;;  %v4529_v37 = vsub.f32 %v4520_v11, %v4519_v6 }
 0x2d9   : > { %v712_v3 = vcvt.f32.s32 %v711_v62  ;;  %755 = vmin.xlane.f32.xlu1 %v754_v45  ;;  %v1255_v62 = vpop.xlane.xlu1 %1254  ;;  %v1198_v45 = vshll.u32 %v1197_v50, 16 }
 0x2da   : > { %v1256_v19 = vcvt.f32.s32 %v1255_v62  ;;  %v1226_v62 = vcvt.f32.s32 %v3574_v52  ;;  %v2233_v52 = vsel %vm1311_vm8, 1.0, %v4524_v16 }
 0x2db   : > { %v3616_v9 = vadd.s32 %v714_v41, %v712_v3  ;;  %v1212_v3 = vcvt.f32.s32 %v3483_v2  ;;  %v1258_v41 = vshll.u32 %v1257_v46, 16  ;;  %v1196_v2 = vcvt.f32.s32 %v3579_v17 }
 0x2dc   : > { %v1300_v57 = vpop.xlane.xlu0 %1299  ;;  %v1243_v17 = vshll.u32 %v1242_v22, 16  ;;  %v2232_v46 = vsel %vm1310_vm7, 1.0, %v4524_v16  ;;  %v3652_v29 = vpop.eup %2492  ;;  %v1385_v22 = vmul.f32 1.442695, %v4528_v20  ;;  %v1229_v7 = vadd.s32 %v1228_v36, %v1226_v62  ;;  %v4536_v36 = vld [vmem:[#allocation44_spill] sm:$0xff] }
 0x2dd   : > { %v1301_v35 = vcvt.f32.s32 %v1300_v57  ;;  %v1213_v1 = vshll.u32 %v1212_v3, 16  ;;  %v1259_v51 = vadd.s32 %v1258_v41, %v1256_v19  ;;  %v1199_v57 = vadd.s32 %v1198_v45, %v1196_v2  ;;  %v4531_v45 = vld [vmem:[#allocation10_spill] sm:$0xff] }
 0x2de   : > { %v1363_v3 = vsub.f32 %v4527_v55, %v4526_v54  ;;  %v1244_v50 = vadd.s32 %v1243_v17, %v1241_v8  ;;  %v1369_v2 = vmul.f32 1.442695, %v4529_v37  ;;  %2494 = vpow2.f32 %v1385_v22 }
 0x2df   : > { %v1304_v49 = vadd.s32 %v1303_v47, %v1301_v35  ;;  %v1214_v25 = vadd.s32 %v1213_v1, %v1211_v56  ;;  %v2234_v47 = vsel %vm1312_vm6, 1.0, %v4524_v16  ;;  %vm1317_vm2 = vcmp.eq.s32.totalorder %v4505_v53, %v1259_v51  ;;  %v4530_v51 = vld [vmem:[#allocation27_spill] sm:$0xff] }
 0x2e0   : > { %v2453_v56 = vpack.i.bf16 %v2234_v47, %v2233_v52  ;;  %vm1313_vm12 = vcmp.eq.s32.totalorder %v4505_v53, %v1199_v57  ;;  %v2239_v31 = vsel %vm1317_vm2, 1.0, %v4524_v16  ;;  %vm1316_vm13 = vcmp.eq.s32.totalorder %v4505_v53, %v1244_v50  ;;  %v4534_v57 = vld [vmem:[#allocation30_spill] sm:$0xff]  ;;  %v4535_v47 = vld [vmem:[#allocation12_spill] sm:$0xff] }
 0x2e1   : > { %vm1320_vm5 = vcmp.eq.s32.totalorder %v4505_v53, %v1304_v49  ;;  %v2231_v49 = vsel %vm1309_vm9, 1.0, %v4524_v16  ;;  %vm1314_vm10 = vcmp.eq.s32.totalorder %v4505_v53, %v1214_v25  ;;  %v1354_v17 = vsub.f32 %v4531_v45, %v4530_v51 }
 0x2e2   : > { %v3634_v35 = vsel %vm1320_vm5, 1.0, %v4524_v16  ;;  %v2448_v41 = vpack.i.bf16 %v2232_v46, %v2231_v49  ;;  %v2236_v12 = vsel %vm1314_vm10, 1.0, %v4524_v16  ;;  %v1389_v8 = vmul.f32 1.442695, %v1363_v3 }
 0x2e3   : > { %v2473_v39 = vpack.i.bf16 %v3634_v35, %v3631_v15  ;;  %v2235_v25 = vsel %vm1313_vm12, 1.0, %v4524_v16  ;;  %vm1315_vm14 = vcmp.eq.s32.totalorder %v4505_v53, %v1229_v7  ;;  %v2238_v62 = vsel %vm1316_vm13, 1.0, %v4524_v16  ;;  %v4546_v15 = vld [vmem:[#allocation48_spill] sm:$0xff] }
 0x2e4   : > { %v1270_v42 = vpop.xlane.xlu0 %1269  ;;  %v2458_v46 = vpack.i.bf16 %v2236_v12, %v2235_v25  ;;  %2496 = vpow2.f32 %v1369_v2  ;;  %v1371_v6 = vmul.f32 1.442695, %v1354_v17  ;;  %v1356_v54 = vsub.f32 %v4535_v47, %v4534_v57  ;;  %v4547_v35 = vld [vmem:[#allocation16_spill] sm:$0xff] }
 0x2e5   : > { %v1271_v60 = vcvt.f32.s32 %v1270_v42  ;;  %v4532_v42 = vld [vmem:[#allocation51_spill] sm:$0xff]  ;;  %v2237_v3 = vsel %vm1315_vm14, 1.0, %v4524_v16  ;;  %2498 = vpow2.f32 %v1389_v8  ;;  %v4544_v8 = vld [vmem:[#allocation17_spill] sm:$0xff] }
 0x2e6   : > { %v2463_v52 = vpack.i.bf16 %v2238_v62, %v2237_v3  ;;  %2500 = vpow2.f32 %v1371_v6  ;;  %v1375_v20 = vmul.f32 1.442695, %v1356_v54  ;;  %v4549_v54 = vld [vmem:[#allocation59_spill] sm:$0xff] }
 0x2e7   : > { %v1274_v19 = vadd.s32 %v1273_v0, %v1271_v60  ;;  %v4533_v0 = vld [vmem:[#allocation20_spill] sm:$0xff]  ;;  %v4550_v3 = vld [vmem:[#allocation23_spill] sm:$0xff] }
 0x2e8   : > { %v1365_v60 = vsub.f32 %v4533_v0, %v4532_v42 }
 0x2e9   : > { %vm1318_vm11 = vcmp.eq.s32.totalorder %v4505_v53, %v1274_v19  ;;  %v4537_v19 = vld [vmem:[#allocation18_spill] sm:$0xff] }
 0x2ea   : > { %v2240_v4 = vsel %vm1318_vm11, 1.0, %v4524_v16  ;;  %2454 = vrot.lane.b32.xlu0 %v2453_v56, %s2711_s21  ;;  %2449 = vrot.lane.b32.xlu1 %v2448_v41, %s2711_s21  ;;  %v1367_v49 = vsub.f32 %v4537_v19, %v4536_v36  ;;  %v1393_v50 = vmul.f32 1.442695, %v1365_v60  ;;  %v4538_v41 = vld [vmem:[#allocation40_spill] sm:$0xff]  ;;  %v4539_v56 = vld [vmem:[#allocation19_spill] sm:$0xff]  ;;  %v1366_v36 = vsub.f32 %v4550_v3, %v4549_v54 }
 0x2eb   : > { %v2468_v1 = vpack.i.bf16 %v2240_v4, %v2239_v31  ;;  %v1358_v7 = vsub.f32 %v4539_v56, %v4538_v41  ;;  %v4540_v31 = vld [vmem:[#allocation38_spill] sm:$0xff]  ;;  %v3699_v2 = vpop.eup %2494  ;;  %v623_v54 = vcvt.f32.s32 %v3387_v59 }
 0x2ec   : > { %v1397_v22 = vmul.f32 1.442695, %v1367_v49  ;;  %2502 = vpow2.f32 %v1393_v50  ;;  %v4541_v4 = vld [vmem:[#allocation14_spill] sm:$0xff]  ;;  %4542 = vst [vmem:[#allocation65_spill] sm:$0xff] %v3699_v2 }
 0x2ed   : > { %2504 = vpow2.f32 %v1375_v20  ;;  %v1360_v12 = vsub.f32 %v4541_v4, %v4540_v31  ;;  %v1379_v37 = vmul.f32 1.442695, %v1358_v7  ;;  %v4552_v50 = vld [vmem:[#allocation54_spill] sm:$0xff]  ;;  %v4554_v7 = vld [vmem:[#allocation28_spill] sm:$0xff] }
 0x2ee   : > { %1421 = vrot.lane.b32.xlu0 %v3636_v28, %s2713_s16  ;;  %2459 = vrot.lane.b32.xlu1 %v2458_v46, %s2711_s21  ;;  %2506 = vpow2.f32 %v1397_v22  ;;  %v1395_v22 = vmul.f32 1.442695, %v1366_v36  ;;  %v854_v31 = vsub.f32 %v4520_v11, %v4554_v7  ;;  %v4558_v11 = vlaneseq }
 0x2ef   : > { %v1383_v17 = vmul.f32 1.442695, %v1360_v12  ;;  %2508 = vpow2.f32 %v1379_v37  ;;  %v593_v36 = vcvt.f32.s32 %v3402_v61  ;;  %v624_v61 = vshll.u32 %v623_v54, 16 }
 0x2f1   : > { %v3707_v51 = vpop.eup %2496  ;;  %2510 = vpow2.f32 %v1383_v17  ;;  %v870_v17 = vmul.f32 1.442695, %v854_v31 }
 0x2f2   : > { %1425 = vrot.lane.b32.xlu0 %v3652_v29, %s2713_s16  ;;  %2464 = vrot.lane.b32.xlu1 %v2463_v52, %s2711_s21  ;;  %v3711_v42 = vpop.eup %2498  ;;  %v4553_v52 = vld [vmem:[#allocation21_spill] sm:$0xff] }
 0x2f3   : > { %4545 = vst [vmem:[#allocation24_spill] sm:$0xff] %v3711_v42  ;;  %v3717_v60 = vpop.eup %2500  ;;  %v1368_v20 = vsub.f32 %v4553_v52, %v4552_v50  ;;  %v607_v50 = vcvt.f32.s32 %v3523_v33 }
 0x2f5   : > { %v1399_v12 = vmul.f32 1.442695, %v1368_v20 }
 0x2f6   : > { %1429 = vrot.lane.b32.xlu0 %v3642_v10, %s2713_s16  ;;  %2469 = vrot.lane.b32.xlu1 %v2468_v1, %s2711_s21  ;;  %v4543_v1 = vld [vmem:[#allocation50_spill] sm:$0xff] }
 0x2f7   : > { %v1362_v25 = vsub.f32 %v4544_v8, %v4543_v1 }
 0x2f9   : > { %v1387_v46 = vmul.f32 1.442695, %v1362_v25  ;;  %v3721_v62 = vpop.eup %2502 }
 0x2fa   : > { %1433 = vrot.lane.b32.xlu0 %v3699_v2, %s2713_s16  ;;  %2474 = vrot.lane.b32.xlu1 %v2473_v39, %s2711_s21  ;;  %v1364_v39 = vsub.f32 %v4547_v35, %v4546_v15  ;;  %4548 = vst [vmem:[#allocation8_spill] sm:$0xff] %v3721_v62  ;;  %v3727_v6 = vpop.eup %2504  ;;  %v3758_v15 = vshrl.u32 %v4558_v11, 7  ;;  %s2244_s21 = sshll.u32 %s2819_s13, 7  ;;  %v4592_v2 = vld [vmem:[#allocation64_spill] sm:$0xff]  ;;  %s2078_s13 = sshll.u32 %s2832_s28, 4  ;;  %s2079_s13 = int_to_ptr.vmem [resolvable:$true] %s2078_s13 }
 0x2fb   : > { %2512 = vpow2.f32 %v1387_v46  ;;  %v3731_v49 = vpop.eup %2506  ;;  %v608_v46 = vcvt.f32.s32 %v3372_v5  ;;  %v3774_v31 = vstv %s2244_s21  ;;  %s2616_s8 = scalar_lea.vmem %s2079_s13, 32  ;;  %p2623_p4 = scmp.lt.s32.totalorder %s2079_s13, %s2621_s14 }
 0x2fc   : > { %v1391_v57 = vmul.f32 1.442695, %v1364_v39  ;;  %4551 = vst [vmem:[#allocation29_spill] sm:$0xff] %v3731_v49  ;;  %v3739_v41 = vpop.eup %2508  ;;  %v1647_v20 = vadd.s32 16, %v3758_v15  ;;  %v1648_v33 = vadd.s32 24, %v3758_v15  ;;  %p2617_p0 = scmp.ne.s32.totalorder %s2079_s13, %s2616_s8 }
 0x2fd   : > { %v609_v5 = vshll.u32 %v608_v46, 16 }
 0x2fe   : > { %1437 = vrot.lane.b32.xlu0 %v3711_v42, %s2713_s16  ;;  %1417 = vrot.lane.b32.xlu1 %v3707_v51, %s2713_s16  ;;  %2514 = vpow2.f32 %v1391_v57  ;;  %v3745_v37 = vpop.eup %2510  ;;  %v578_v57 = vcvt.f32.s32 %v3382_v34  ;;  %v592_v34 = vcvt.f32.s32 %v3554_v44  ;;  %p2618_p1 = pnand %p2617_p0, %p2794_p3 }
 0x2ff   : > { %2516 = vpow2.f32 %v1395_v22  ;;  %4555 = vst [vmem:[#allocation11_spill] sm:$0xff] %v3745_v37  ;;  %v1646_v22 = vadd.s32 8, %v3758_v15 }
 0x300   : > { %2518 = vpow2.f32 %v1399_v12  ;;  %v577_v12 = vcvt.f32.s32 %v3537_v23  ;;  %v579_v59 = vshll.u32 %v578_v57, 16  ;;  %v1665_v57 = vadd.s32 %v3774_v31, %v1648_v33  ;;  %p2619_p2 = pneg %p2618_p1 }
 0x301   : > { %2520 = vpow2.f32 %v870_v17  ;;  %v622_v17 = vcvt.f32.s32 %v3533_v48  ;;  %v1663_v46 = vadd.s32 %v3774_v31, %v1646_v22  ;;  %v1662_v48 = vadd.s32 %v3774_v31, %v3758_v15 }
 0x302   : > { %1441 = vrot.lane.b32.xlu0 %v3721_v62, %s2713_s16  ;;  %1419 = vrot.lane.b32.xlu1 %v3717_v60, %s2713_s16  ;;  %v1664_v62 = vadd.s32 %v3774_v31, %v1647_v20  ;;  %v580_v44 = vadd.s32 %v579_v59, %v577_v12  ;;  %vm1681_vm9 = vcmp.lt.s32.totalorder %v1665_v57, 400 }
 0x303   : > { %vm1679_vm4 = vcmp.lt.s32.totalorder %v1663_v46, 400  ;;  %vm1678_vm5 = vcmp.lt.s32.totalorder %v1662_v48, 400  ;;  %v3814_v33 = vsel %vm1681_vm9, 1.0, %v4524_v16 }
 0x304   : > { %vm1680_vm0 = vcmp.lt.s32.totalorder %v1664_v62, 400  ;;  %vm806_vm6 = vcmp.eq.s32.totalorder %v4505_v53, %v580_v44  ;;  %4562 = vst [vmem:[#allocation9_spill] sm:$0xff] %v3814_v33 }
 0x305   : > { %v3797_v20 = vsel %vm1680_vm0, 1.0, %v4524_v16  ;;  %vm815_vm0 = vcmp.eq.s32.totalorder %v4505_v53, %v3616_v9 }
 0x306   : > { %1445 = vrot.lane.b32.xlu0 %v3731_v49, %s2713_s16  ;;  %1423 = vrot.lane.b32.xlu1 %v3727_v6, %s2713_s16  ;;  %v594_v49 = vshll.u32 %v593_v36, 16 }
 0x308   : > { %v3749_v1 = vpop.eup %2512  ;;  %v595_v42 = vadd.s32 %v594_v49, %v592_v34 }
 0x309   : > { %4556 = vst [vmem:[#allocation32_spill] sm:$0xff] %v3749_v1 }
 0x30a   : > { %1427 = vrot.lane.b32.xlu1 %v3739_v41, %s2713_s16  ;;  %vm807_vm8 = vcmp.eq.s32.totalorder %v4505_v53, %v595_v42 }
 0x30b   : > { %v3753_v25 = vpop.eup %2514  ;;  %v2212_v59 = vsel %vm807_vm8, 1.0, %v4524_v16 }
 0x30c   : > { %4557 = vst [vmem:[#allocation13_spill] sm:$0xff] %v3753_v25  ;;  %v3760_v39 = vpop.eup %2516 }
 0x30d   : > { %4559 = vst [vmem:[#allocation60_spill] sm:$0xff] %v3760_v39  ;;  %v3772_v7 = vpop.eup %2518 }
 0x30e   : > { %1431 = vrot.lane.b32.xlu1 %v3745_v37, %s2713_s16  ;;  %4560 = vst [vmem:[#allocation25_spill] sm:$0xff] %v3772_v7  ;;  %v3782_v11 = vpop.eup %2520 }
 0x30f   : > { %v902_v54 = vsel %vm483_vm3, %v3782_v11, 0.0 }
 0x312   : > { %1435 = vrot.lane.b32.xlu1 %v3749_v1, %s2713_s16  ;;  %v4590_v1 = vld [vmem:[#allocation57_spill] sm:$0xff] }
 0x316   : > { %1439 = vrot.lane.b32.xlu1 %v3753_v25, %s2713_s16  ;;  %v625_v25 = vadd.s32 %v624_v61, %v622_v17  ;;  %v3804_v17 = vsel %vm1678_vm5, 1.0, %v4524_v16  ;;  %v2211_v61 = vsel %vm806_vm6, 1.0, %v4524_v16 }
 0x318   : > { %vm809_vm7 = vcmp.eq.s32.totalorder %v4505_v53, %v625_v25  ;;  %v4561_v25 = vld [vmem:[#allocation33_spill] sm:$0xff] }
 0x319   : > { %v855_v42 = vsub.f32 %v4531_v45, %v4561_v25  ;;  %v2214_v34 = vsel %vm809_vm7, 1.0, %v4524_v16 }
 0x31a   : > { %1443 = vrot.lane.b32.xlu1 %v3760_v39, %s2713_s16  ;;  %v610_v39 = vadd.s32 %v609_v5, %v607_v50 }
 0x31b   : > { %v872_v44 = vmul.f32 1.442695, %v855_v42 }
 0x31c   : > { %vm808_vm15 = vcmp.eq.s32.totalorder %v4505_v53, %v610_v39  ;;  %v3800_v39 = vsel %vm1679_vm4, 1.0, %v4524_v16 }
 0x31d   : > { %v2213_v49 = vsel %vm808_vm15, 1.0, %v4524_v16  ;;  %2522 = vpow2.f32 %v872_v44 }
 0x31e   : > { %1447 = vrot.lane.b32.xlu1 %v3772_v7, %s2713_s16 }
 0x31f   : > { %v2440_v23 = vpop.permute.xlu0 %2439 }
 0x320   : > { %v2441_v36 = vunpack.i.l.bf16 %v2440_v23  ;;  %v2442_v50 = vunpack.i.h.bf16 %v2440_v23 }
 0x322   : > { %v1611_v22 = vsel %vm483_vm3, %v2213_v49, %v2441_v36  ;;  %v1612_v46 = vsel %vm483_vm3, %v2214_v34, %v2442_v50  ;;  %v4563_v36 = vld [vmem:[#allocation26_spill] sm:$0xff] }
 0x323   : > { %v1728_v57 = vmul.f32 %v3797_v20, %v1611_v22  ;;  %v856_v49 = vsub.f32 %v4511_v26, %v4563_v36 }
 0x325   : > { %903 = vadd.xlane.f32.xlu0 %v902_v54  ;;  %v1974_v22 = vsel %vm361_vm1, %v1728_v57, 0.0  ;;  %v874_v34 = vmul.f32 1.442695, %v856_v49  ;;  %v4568_v49 = vld [vmem:[#allocation35_spill] sm:$0xff] }
 0x327   : > { %v2445_v62 = vpop.permute.xlu1 %2444  ;;  %2524 = vpow2.f32 %v874_v34 }
 0x328   : > { %v2447_v5 = vunpack.i.h.bf16 %v2445_v62  ;;  %v2446_v12 = vunpack.i.l.bf16 %v2445_v62  ;;  %v1729_v62 = vmul.f32 %v3814_v33, %v1612_v46  ;;  %v4565_v46 = vld [vmem:[#allocation34_spill] sm:$0xff] }
 0x32a   : > { %v1610_v23 = vsel %vm483_vm3, %v2212_v59, %v2447_v5  ;;  %v1609_v48 = vsel %vm483_vm3, %v2211_v61, %v2446_v12  ;;  %v4564_v59 = vld [vmem:[#allocation31_spill] sm:$0xff]  ;;  %v1976_v42 = vsel %vm361_vm1, %v1729_v62, 0.0 }
 0x32b   : > { %v1727_v45 = vmul.f32 %v3800_v39, %v1610_v23  ;;  %v1726_v54 = vmul.f32 %v3804_v17, %v1609_v48  ;;  %v857_v26 = vsub.f32 %v4535_v47, %v4564_v59  ;;  %v861_v23 = vsub.f32 %v4541_v4, %v4565_v46  ;;  %v4566_v48 = vld [vmem:[#allocation37_spill] sm:$0xff]  ;;  %v4572_v59 = vld [vmem:[#allocation46_spill] sm:$0xff] }
 0x32c   : > { %v860_v47 = vsub.f32 %v4513_v40, %v4568_v49  ;;  %v4573_v40 = vld [vmem:[#allocation49_spill] sm:$0xff] }
 0x32d   : > { %2339 = vmatprep.mubr.msk.f32.mxu1 %vm361_vm1, %v1726_v54  ;;  %v1971_v50 = vsel %vm361_vm1, %v1726_v54, 0.0  ;;  %v1972_v5 = vsel %vm361_vm1, %v1727_v45, 0.0  ;;  %v4567_v54 = vld [vmem:[#allocation36_spill] sm:$0xff]  ;;  %v884_v44 = vmul.f32 1.442695, %v861_v23  ;;  %v4574_v46 = vld [vmem:[#allocation61_spill] sm:$0xff] }
 0x32e   : > { %v1973_v25 = vadd.f32 %v1972_v5, %v1971_v50  ;;  %2340 = vmatmul.mubr.msk.f32.vlgmr.msra.gmra.mxu1 %vm361_vm1, %v1727_v45  ;;  %v864_v45 = vsub.f32 %v4527_v55, %v4566_v48  ;;  %v858_v36 = vsub.f32 %v4517_v58, %v4567_v54  ;;  %v4569_v50 = vld [vmem:[#allocation39_spill] sm:$0xff]  ;;  %v882_v34 = vmul.f32 1.442695, %v860_v47  ;;  %v4576_v54 = vld [vmem:[#allocation52_spill] sm:$0xff] }
 0x32f   : > { %2342 = vmatprep.mubr.msk.f32.mxu1 %vm361_vm1, %v1728_v57  ;;  %v876_v57 = vmul.f32 1.442695, %v857_v26  ;;  %v865_v5 = vsub.f32 %v4547_v35, %v4569_v50  ;;  %v862_v58 = vsub.f32 %v4523_v27, %v4572_v59  ;;  %v867_v23 = vsub.f32 %v4550_v3, %v4574_v46 }
 0x330   : > { %v1975_v12 = vadd.f32 %v1974_v22, %v1973_v25  ;;  %v890_v25 = vmul.f32 1.442695, %v864_v45  ;;  %v878_v4 = vmul.f32 1.442695, %v858_v36 }
 0x331   : > { %2526 = vpow2.f32 %v876_v57  ;;  %v892_v26 = vmul.f32 1.442695, %v865_v5  ;;  %v886_v57 = vmul.f32 1.442695, %v862_v58  ;;  %v896_v36 = vmul.f32 1.442695, %v867_v23 }
 0x332   : > { %v3834_v61 = vadd.f32 %v1976_v42, %v1975_v12  ;;  %2343 = vmatmul.mubr.msk.f32.gmra.mxu1 %vm361_vm1, %v1729_v62  ;;  %v4570_v62 = vld [vmem:[#allocation42_spill] sm:$0xff]  ;;  %v4571_v12 = vld [vmem:[#allocation41_spill] sm:$0xff]  ;;  %2528 = vpow2.f32 %v884_v44  ;;  %v866_v42 = vsub.f32 %v4533_v0, %v4573_v40  ;;  %v869_v0 = vsub.f32 %v4553_v52, %v4576_v54 }
 0x333   : > { %v863_v22 = vsub.f32 %v4544_v8, %v4570_v62  ;;  %v859_v55 = vsub.f32 %v4539_v56, %v4571_v12  ;;  %2530 = vpow2.f32 %v890_v25  ;;  %v4575_v8 = vld [vmem:[#allocation47_spill] sm:$0xff]  ;;  %v3859_v56 = vpop.eup %2522  ;;  %v668_v40 = vcvt.f32.s32 %v3412_v21 }
 0x334   : > { %2532 = vpow2.f32 %v878_v4  ;;  %v868_v48 = vsub.f32 %v4537_v19, %v4575_v8  ;;  %v894_v27 = vmul.f32 1.442695, %v866_v42  ;;  %v905_v3 = vsel %vm483_vm3, %v3859_v56, 0.0  ;;  %v3865_v47 = vpop.eup %2524 }
 0x335   : > { %v888_v35 = vmul.f32 1.442695, %v863_v22  ;;  %v880_v45 = vmul.f32 1.442695, %v859_v55  ;;  %2534 = vpow2.f32 %v882_v34  ;;  %v900_v19 = vmul.f32 1.442695, %v869_v0 }
 0x336   : > { %2536 = vpow2.f32 %v892_v26  ;;  %v898_v49 = vmul.f32 1.442695, %v868_v48  ;;  %v908_v44 = vsel %vm483_vm3, %v3865_v47, 0.0  ;;  %v683_v42 = vcvt.f32.s32 %v3428_v32 }
 0x337   : > { %2538 = vpow2.f32 %v888_v35  ;;  %v638_v8 = vcvt.f32.s32 %v3430_v63  ;;  %v667_v32 = vcvt.f32.s32 %v3559_v18  ;;  %v653_v54 = vcvt.f32.s32 %v3437_v43 }
 0x338   : > { %2540 = vpow2.f32 %v880_v45  ;;  %v637_v0 = vcvt.f32.s32 %v3570_v30 }
 0x339   : > { %2542 = vpow2.f32 %v886_v57  ;;  %v682_v57 = vcvt.f32.s32 %v3564_v24  ;;  %v639_v30 = vshll.u32 %v638_v8, 16 }
 0x33a   : > { %2544 = vpow2.f32 %v894_v27 }
 0x33b   : > { %2546 = vpow2.f32 %v896_v36 }
 0x33c   : > { %2548 = vpow2.f32 %v898_v49  ;;  %v669_v49 = vshll.u32 %v668_v40, 16 }
 0x33d   : > { %2550 = vpow2.f32 %v900_v19  ;;  %v728_v19 = vcvt.f32.s32 %v3452_v14 }
 0x33e   : > { %v3869_v50 = vpop.eup %2526  ;;  %v670_v40 = vadd.s32 %v669_v49, %v667_v32  ;;  %v1650_v49 = vadd.s32 40, %v3758_v15 }
 0x33f   : > { %v3871_v52 = vpop.eup %2528  ;;  %v911_v25 = vsel %vm483_vm3, %v3869_v50, 0.0 }
 0x340   : > { %4577 = vst [vmem:[#allocation62_spill] sm:$0xff] %v3871_v52  ;;  %v3873_v5 = vpop.eup %2530  ;;  %v923_v48 = vsel %vm483_vm3, %v3871_v52, 0.0  ;;  %vm812_vm2 = vcmp.eq.s32.totalorder %v4505_v53, %v670_v40  ;;  %v1667_v40 = vadd.s32 %v3774_v31, %v1650_v49  ;;  %v1657_v49 = vadd.s32 96, %v3758_v15 }
 0x341   : > { %4578 = vst [vmem:[#allocation45_spill] sm:$0xff] %v3873_v5  ;;  %v3877_v62 = vpop.eup %2532  ;;  %v3916_v27 = vsel %vm483_vm3, %v3873_v5, 0.0  ;;  %v654_v5 = vshll.u32 %v653_v54, 16 }
 0x342   : > { %906 = vadd.xlane.f32.xlu1 %v905_v3  ;;  %v3879_v22 = vpop.eup %2534  ;;  %v914_v55 = vsel %vm483_vm3, %v3877_v62, 0.0  ;;  %v684_v3 = vshll.u32 %v683_v42, 16  ;;  %vm1683_vm7 = vcmp.lt.s32.totalorder %v1667_v40, 400  ;;  %v1674_v40 = vadd.s32 %v3774_v31, %v1657_v49 }
 0x343   : > { %4579 = vst [vmem:[#allocation22_spill] sm:$0xff] %v3879_v22  ;;  %v3881_v4 = vpop.eup %2536  ;;  %v920_v46 = vsel %vm483_vm3, %v3879_v22, 0.0  ;;  %v4028_v9 = vsel %vm1683_vm7, 1.0, %v4524_v16 }
 0x344   : > { %4580 = vst [vmem:[#allocation43_spill] sm:$0xff] %v3881_v4  ;;  %v3883_v12 = vpop.eup %2538  ;;  %v3920_v63 = vsel %vm483_vm3, %v3881_v4, 0.0  ;;  %v685_v42 = vadd.s32 %v684_v3, %v682_v57  ;;  %v4589_v4 = vld [vmem:[#allocation58_spill] sm:$0xff] }
 0x345   : > { %4581 = vst [vmem:[#allocation15_spill] sm:$0xff] %v3883_v12  ;;  %v3887_v34 = vpop.eup %2540  ;;  %v3910_v21 = vsel %vm483_vm3, %v3883_v12, 0.0  ;;  %v652_v14 = vcvt.f32.s32 %v4589_v4  ;;  %v640_v12 = vadd.s32 %v639_v30, %v637_v0  ;;  %v1649_v0 = vadd.s32 32, %v3758_v15 }
 0x346   : > { %909 = vadd.xlane.f32.xlu1 %v908_v44  ;;  %v3889_v59 = vpop.eup %2542  ;;  %v917_v35 = vsel %vm483_vm3, %v3887_v34, 0.0  ;;  %vm813_vm10 = vcmp.eq.s32.totalorder %v4505_v53, %v685_v42 }
 0x347   : > { %4582 = vst [vmem:[#allocation27_spill] sm:$0xff] %v3889_v59  ;;  %v3891_v58 = vpop.eup %2544  ;;  %v926_v45 = vsel %vm483_vm3, %v3889_v59, 0.0  ;;  %v727_v59 = vcvt.f32.s32 %v4590_v1  ;;  %v1652_v1 = vadd.s32 56, %v3758_v15  ;;  %vm810_vm11 = vcmp.eq.s32.totalorder %v4505_v53, %v640_v12 }
 0x348   : > { %4583 = vst [vmem:[#allocation10_spill] sm:$0xff] %v3891_v58  ;;  %v3893_v26 = vpop.eup %2546  ;;  %v3926_v36 = vsel %vm483_vm3, %v3891_v58, 0.0 }
 0x349   : > { %4584 = vst [vmem:[#allocation51_spill] sm:$0xff] %v3893_v26  ;;  %v3901_v23 = vpop.eup %2548  ;;  %v3930_v18 = vsel %vm483_vm3, %v3893_v26, 0.0  ;;  %v4588_v26 = vld [vmem:[#allocation53_spill] sm:$0xff]  ;;  %v1669_v30 = vadd.s32 %v3774_v31, %v1652_v1 }
 0x34a   : > { %912 = vadd.xlane.f32.xlu1 %v911_v25  ;;  %4585 = vst [vmem:[#allocation20_spill] sm:$0xff] %v3901_v23  ;;  %v3932_v24 = vpop.eup %2550  ;;  %v3939_v43 = vsel %vm483_vm3, %v3901_v23, 0.0  ;;  %v743_v25 = vcvt.f32.s32 %v3473_v38  ;;  %v803_v58 = vcvt.f32.s32 %v4588_v26  ;;  %v729_v38 = vshll.u32 %v728_v19, 16  ;;  %v4591_v23 = vld [vmem:[#allocation55_spill] sm:$0xff] }
 0x34b   : > { %4586 = vst [vmem:[#allocation30_spill] sm:$0xff] %v3932_v24  ;;  %v3949_v8 = vsel %vm483_vm3, %v3932_v24, 0.0  ;;  %v1651_v26 = vadd.s32 48, %v3758_v15  ;;  %v1653_v19 = vadd.s32 64, %v3758_v15  ;;  %vm1685_vm5 = vcmp.lt.s32.totalorder %v1669_v30, 400 }
 0x34c   : > { %v744_v32 = vshll.u32 %v743_v25, 16  ;;  %v3961_v54 = vshll.u32 %v803_v58, 16  ;;  %v1656_v25 = vadd.s32 88, %v3758_v15 }
 0x34d   : > { %v1668_v58 = vadd.s32 %v3774_v31, %v1651_v26  ;;  %v1670_v12 = vadd.s32 %v3774_v31, %v1653_v19  ;;  %v2220_v19 = vsel %vm815_vm0, 1.0, %v4524_v16 }
 0x34e   : > { %915 = vadd.xlane.f32.xlu1 %v914_v55  ;;  %v788_v55 = vcvt.f32.s32 %v3489_v13  ;;  %v773_v13 = vcvt.f32.s32 %v4591_v23  ;;  %v655_v23 = vadd.s32 %v654_v5, %v652_v14  ;;  %v1654_v5 = vadd.s32 72, %v3758_v15 }
 0x34f   : > { %v2218_v14 = vsel %vm813_vm10, 1.0, %v4524_v16  ;;  %vm1684_vm4 = vcmp.lt.s32.totalorder %v1668_v58, 400  ;;  %vm1686_vm8 = vcmp.lt.s32.totalorder %v1670_v12, 400 }
 0x350   : > { %v3956_v57 = vshll.u32 %v788_v55, 16  ;;  %v3968_v3 = vshll.u32 %v773_v13, 16  ;;  %v2217_v55 = vsel %vm812_vm2, 1.0, %v4524_v16  ;;  %vm811_vm12 = vcmp.eq.s32.totalorder %v4505_v53, %v655_v23 }
 0x351   : > { %v1666_v13 = vadd.s32 %v3774_v31, %v1649_v0  ;;  %v2216_v1 = vsel %vm811_vm12, 1.0, %v4524_v16  ;;  %v4032_v12 = vsel %vm1686_vm8, 1.0, %v4524_v16 }
 0x352   : > { %918 = vadd.xlane.f32.xlu1 %v917_v35  ;;  %v4587_v35 = vld [vmem:[#allocation56_spill] sm:$0xff] }
 0x353   : > { %v758_v7 = vcvt.f32.s32 %v4587_v35  ;;  %v742_v35 = vcvt.f32.s32 %v4592_v2  ;;  %v730_v2 = vadd.s32 %v729_v38, %v727_v59  ;;  %v1655_v59 = vadd.s32 80, %v3758_v15  ;;  %v4593_v38 = vld [vmem:[#allocation7_spill] sm:$0xff] }
 0x354   : > { %vm814_vm14 = vcmp.eq.s32.totalorder %v4505_v53, %v4593_v38  ;;  %vm1682_vm6 = vcmp.lt.s32.totalorder %v1666_v13, 400 }
 0x355   : > { %v3935_v44 = vpop.xlane.xlu0 %770  ;;  %v3958_v4 = vshll.u32 %v758_v7, 16  ;;  %v745_v7 = vadd.s32 %v744_v32, %v742_v35  ;;  %vm816_vm13 = vcmp.eq.s32.totalorder %v4505_v53, %v730_v2  ;;  %v1671_v35 = vadd.s32 %v3774_v31, %v1654_v5 }
 0x356   : > { %921 = vadd.xlane.f32.xlu1 %v920_v46  ;;  %v1672_v26 = vadd.s32 %v3774_v31, %v1655_v59  ;;  %v1673_v32 = vadd.s32 %v3774_v31, %v1656_v25  ;;  %v4003_v23 = vsel %vm816_vm13, 1.0, %v4524_v16  ;;  %v2219_v2 = vsel %vm814_vm14, 1.0, %v4524_v16 }
 0x357   : > { %vm817_vm15 = vcmp.eq.s32.totalorder %v4505_v53, %v745_v7  ;;  %v4017_v5 = vsel %vm1684_vm4, 1.0, %v4524_v16  ;;  %v4021_v59 = vsel %vm1685_vm5, 1.0, %v4524_v16  ;;  %vm1687_vm9 = vcmp.lt.s32.totalorder %v1671_v35, 400 }
 0x358   : > { %v4008_v7 = vsel %vm817_vm15, 1.0, %v4524_v16  ;;  %vm1688_vm2 = vcmp.lt.s32.totalorder %v1672_v26, 400  ;;  %vm1689_vm10 = vcmp.lt.s32.totalorder %v1673_v32, 400  ;;  %v4025_v13 = vsel %vm1682_vm6, 1.0, %v4524_v16 }
 0x359   : > { %v3953_v46 = vpop.xlane.xlu0 %785  ;;  %v4037_v26 = vsel %vm1687_vm9, 1.0, %v4524_v16  ;;  %v4040_v32 = vsel %vm1688_vm2, 1.0, %v4524_v16  ;;  %v4043_v52 = vsel %vm1689_vm10, 1.0, %v4524_v16 }
 0x35a   : > { %924 = vadd.xlane.f32.xlu1 %v923_v48 }
 0x35d   : > { %v3970_v48 = vpop.xlane.xlu0 %800 }
 0x35e   : > { %927 = vadd.xlane.f32.xlu1 %v926_v45  ;;  %v2215_v45 = vsel %vm810_vm11, 1.0, %v4524_v16  ;;  %vm1690_vm11 = vcmp.lt.s32.totalorder %v1674_v40, 400 }
 0x361   : > { %v2455_v0 = vpop.permute.xlu0 %2454 }
 0x362   : > { %930 = vadd.xlane.f32.xlu1 %v3910_v21  ;;  %v756_v42 = vpop.xlane.xlu1 %755  ;;  %v1658_v21 = vadd.s32 104, %v3758_v15  ;;  %v2456_v25 = vunpack.i.l.bf16 %v2455_v0  ;;  %v2457_v30 = vunpack.i.h.bf16 %v2455_v0 }
 0x363   : > { %v757_v0 = vcvt.f32.s32 %v756_v42  ;;  %v787_v42 = vcvt.f32.s32 %v3953_v46  ;;  %v4065_v46 = vsel %vm1690_vm11, 1.0, %v4524_v16 }
 0x364   : > { %v1615_v49 = vsel %vm483_vm3, %v2217_v55, %v2456_v25  ;;  %v1616_v33 = vsel %vm483_vm3, %v2218_v14, %v2457_v30  ;;  %v1659_v55 = vadd.s32 112, %v3758_v15 }
 0x365   : > { %v1732_v25 = vmul.f32 %v4017_v5, %v1615_v49  ;;  %v790_v49 = vadd.s32 %v3956_v57, %v787_v42 }
 0x366   : > { %933 = vadd.xlane.f32.xlu1 %v3916_v27  ;;  %v2450_v38 = vpop.permute.xlu1 %2449  ;;  %v1675_v27 = vadd.s32 %v3774_v31, %v1658_v21 }
 0x367   : > { %v2452_v58 = vunpack.i.h.bf16 %v2450_v38  ;;  %v2451_v24 = vunpack.i.l.bf16 %v2450_v38  ;;  %v1982_v40 = vsel %vm361_vm1, %v1732_v25, 0.0  ;;  %vm820_vm15 = vcmp.eq.s32.totalorder %v4505_v53, %v790_v49 }
 0x368   : > { %vm1691_vm12 = vcmp.lt.s32.totalorder %v1675_v27, 400 }
 0x369   : > { %v1614_v35 = vsel %vm483_vm3, %v2216_v1, %v2452_v58  ;;  %v1613_v37 = vsel %vm483_vm3, %v2215_v45, %v2451_v24  ;;  %v772_v1 = vcvt.f32.s32 %v3935_v44 }
 0x36a   : > { %v1731_v38 = vmul.f32 %v4028_v9, %v1614_v35  ;;  %936 = vadd.xlane.f32.xlu1 %v3920_v63  ;;  %v2460_v21 = vpop.permute.xlu1 %2459  ;;  %v1730_v58 = vmul.f32 %v4025_v13, %v1613_v37  ;;  %v1660_v63 = vadd.s32 120, %v3758_v15  ;;  %v760_v37 = vadd.s32 %v3958_v4, %v757_v0 }
 0x36b   : > { %v2461_v22 = vunpack.i.l.bf16 %v2460_v21  ;;  %v2462_v10 = vunpack.i.h.bf16 %v2460_v21  ;;  %v775_v30 = vadd.s32 %v3968_v3, %v772_v1  ;;  %v1733_v35 = vmul.f32 %v4021_v59, %v1616_v33 }
 0x36c   : > { %v1978_v24 = vsel %vm361_vm1, %v1730_v58, 0.0  ;;  %2345 = vmatprep.mubr.msk.f32.mxu1 %vm361_vm1, %v1730_v58  ;;  %v1980_v15 = vsel %vm361_vm1, %v1731_v38, 0.0  ;;  %v1676_v3 = vadd.s32 %v3774_v31, %v1659_v55  ;;  %vm818_vm13 = vcmp.eq.s32.totalorder %v4505_v53, %v760_v37 }
 0x36d   : > { %v1979_v44 = vadd.f32 %v1978_v24, %v3834_v61  ;;  %v1617_v14 = vsel %vm483_vm3, %v2219_v2, %v2461_v22  ;;  %2346 = vmatmul.mubr.msk.f32.gmra.mxu1 %vm361_vm1, %v1731_v38  ;;  %v802_v61 = vcvt.f32.s32 %v3970_v48  ;;  %v1618_v2 = vsel %vm483_vm3, %v2220_v19, %v2462_v10 }
 0x36e   : > { %939 = vadd.xlane.f32.xlu1 %v3926_v36  ;;  %v2465_v45 = vpop.permute.xlu1 %2464  ;;  %2348 = vmatprep.mubr.msk.f32.mxu1 %vm361_vm1, %v1732_v25  ;;  %v1734_v0 = vmul.f32 %v4032_v12, %v1617_v14  ;;  %v4084_v10 = vsel %vm1691_vm12, 1.0, %v4524_v16  ;;  %vm819_vm14 = vcmp.eq.s32.totalorder %v4505_v53, %v775_v30  ;;  %v1984_v48 = vsel %vm361_vm1, %v1733_v35, 0.0 }
 0x36f   : > { %v2466_v4 = vunpack.i.l.bf16 %v2465_v45  ;;  %v1981_v22 = vadd.f32 %v1980_v15, %v1979_v44  ;;  %v2467_v36 = vunpack.i.h.bf16 %v2465_v45  ;;  %v1735_v19 = vmul.f32 %v4037_v26, %v1618_v2 }
 0x370   : > { %v2223_v27 = vsel %vm818_vm13, 1.0, %v4524_v16  ;;  %v1986_v55 = vsel %vm361_vm1, %v1734_v0, 0.0  ;;  %v1677_v25 = vadd.s32 %v3774_v31, %v1660_v63  ;;  %vm1692_vm0 = vcmp.lt.s32.totalorder %v1676_v3, 400 }
 0x371   : > { %v1983_v33 = vadd.f32 %v1982_v40, %v1981_v22  ;;  %v1619_v38 = vsel %vm483_vm3, %v4003_v23, %v2466_v4  ;;  %2349 = vmatmul.mubr.msk.f32.gmra.mxu1 %vm361_vm1, %v1733_v35  ;;  %v805_v23 = vadd.s32 %v3961_v54, %v802_v61  ;;  %v2224_v37 = vsel %vm819_vm14, 1.0, %v4524_v16 }
 0x372   : > { %942 = vadd.xlane.f32.xlu1 %v3930_v18  ;;  %v2470_v57 = vpop.permute.xlu1 %2469  ;;  %2351 = vmatprep.mubr.msk.f32.mxu1 %vm361_vm1, %v1734_v0  ;;  %v1620_v18 = vsel %vm483_vm3, %v4008_v7, %v2467_v36  ;;  %v1736_v42 = vmul.f32 %v4040_v32, %v1619_v38  ;;  %v1988_v44 = vsel %vm361_vm1, %v1735_v19, 0.0  ;;  %vm1693_vm5 = vcmp.lt.s32.totalorder %v1677_v25, 400 }
 0x373   : > { %v2471_v21 = vunpack.i.l.bf16 %v2470_v57  ;;  %v1985_v1 = vadd.f32 %v1984_v48, %v1983_v33  ;;  %v2472_v58 = vunpack.i.h.bf16 %v2470_v57  ;;  %v1737_v14 = vmul.f32 %v4043_v52, %v1620_v18 }
 0x374   : > { %vm821_vm4 = vcmp.eq.s32.totalorder %v4505_v53, %v805_v23  ;;  %v1990_v30 = vsel %vm361_vm1, %v1736_v42, 0.0  ;;  %v4118_v61 = vsel %vm1692_vm0, 1.0, %v4524_v16  ;;  %v4129_v3 = vsel %vm1693_vm5, 1.0, %v4524_v16 }
 0x375   : > { %v1987_v24 = vadd.f32 %v1986_v55, %v1985_v1  ;;  %v1621_v54 = vsel %vm483_vm3, %v2223_v27, %v2471_v21  ;;  %2352 = vmatmul.mubr.msk.f32.gmra.mxu1 %vm361_vm1, %v1735_v19  ;;  %v1622_v45 = vsel %vm483_vm3, %v2224_v37, %v2472_v58  ;;  %v2226_v53 = vsel %vm821_vm4, 1.0, %v4524_v16 }
 0x376   : > { %945 = vadd.xlane.f32.xlu1 %v3939_v43  ;;  %v2475_v7 = vpop.permute.xlu1 %2474  ;;  %2354 = vmatprep.mubr.msk.f32.mxu1 %vm361_vm1, %v1736_v42  ;;  %v2225_v43 = vsel %vm820_vm15, 1.0, %v4524_v16  ;;  %v1738_v15 = vmul.f32 %v4065_v46, %v1621_v54  ;;  %v1992_v36 = vsel %vm361_vm1, %v1737_v14, 0.0  ;;  %v1739_v49 = vmul.f32 %v4084_v10, %v1622_v45  ;;  %v1422_v16 = vpop.permute.xlu0 %1421 }
 0x377   : > { %v2476_v31 = vunpack.i.l.bf16 %v2475_v7  ;;  %v1989_v63 = vadd.f32 %v1988_v44, %v1987_v24  ;;  %v2477_v35 = vunpack.i.h.bf16 %v2475_v7  ;;  %v1471_v27 = vsel %vm483_vm3, %v1422_v16, 0.0 }
 0x378   : > { %v1996_v19 = vsel %vm361_vm1, %v1739_v49, 0.0 }
 0x379   : > { %v1991_v4 = vadd.f32 %v1990_v30, %v1989_v63  ;;  %v1623_v22 = vsel %vm483_vm3, %v2225_v43, %v2476_v31  ;;  %2355 = vmatmul.mubr.msk.f32.gmra.mxu1 %vm361_vm1, %v1737_v14  ;;  %v1624_v33 = vsel %vm483_vm3, %v2226_v53, %v2477_v35 }
 0x37a   : > { %948 = vadd.xlane.f32.xlu1 %v3949_v8  ;;  %v1418_v2 = vpop.permute.xlu1 %1417  ;;  %2357 = vmatprep.mubr.msk.f32.mxu1 %vm361_vm1, %v1738_v15  ;;  %v1994_v8 = vsel %vm361_vm1, %v1738_v15, 0.0  ;;  %v1740_v38 = vmul.f32 %v4118_v61, %v1623_v22  ;;  %v1741_v21 = vmul.f32 %v4129_v3, %v1624_v33  ;;  %v1426_v54 = vpop.permute.xlu0 %1425 }
 0x37b   : > { %v1465_v40 = vsel %vm483_vm3, %v1418_v2, 0.0  ;;  %v1993_v0 = vadd.f32 %v1992_v36, %v1991_v4  ;;  %v1477_v7 = vsel %vm483_vm3, %v1426_v54, 0.0 }
 0x37c   : > { %1466 = vadd.xlane.f32.xlu0 %v1465_v40  ;;  %v1998_v18 = vsel %vm361_vm1, %v1740_v38, 0.0  ;;  %v2000_v55 = vsel %vm361_vm1, %v1741_v21, 0.0 }
 0x37d   : > { %v1995_v57 = vadd.f32 %v1994_v8, %v1993_v0  ;;  %2358 = vmatmul.mubr.msk.f32.gmra.mxu1 %vm361_vm1, %v1739_v49 }
 0x37e   : > { %v1420_v48 = vpop.permute.xlu1 %1419  ;;  %2360 = vmatprep.mubr.msk.f32.mxu1 %vm361_vm1, %v1740_v38  ;;  %v1430_v14 = vpop.permute.xlu0 %1429 }
 0x37f   : > { %v1468_v23 = vsel %vm483_vm3, %v1420_v48, 0.0  ;;  %v1997_v1 = vadd.f32 %v1996_v19, %v1995_v57  ;;  %v1483_v31 = vsel %vm483_vm3, %v1430_v14, 0.0 }
 0x380   : > { %1469 = vadd.xlane.f32.xlu0 %v1468_v23 }
 0x381   : > { %v1999_v58 = vadd.f32 %v1998_v18, %v1997_v1  ;;  %2361 = vmatmul.mubr.msk.f32.gmra.mxu1 %vm361_vm1, %v1741_v21 }
 0x382   : > { %v1424_v25 = vpop.permute.xlu1 %1423  ;;  %v1434_v35 = vpop.permute.xlu0 %1433 }
 0x383   : > { %v4143_v42 = vadd.f32 %v2000_v55, %v1999_v58  ;;  %v1474_v24 = vsel %vm483_vm3, %v1424_v25, 0.0  ;;  %v1489_v43 = vsel %vm483_vm3, %v1434_v35, 0.0 }
 0x384   : > { %1472 = vadd.xlane.f32.xlu0 %v1471_v27 }
 0x386   : > { %v1428_v37 = vpop.permute.xlu1 %1427  ;;  %v1438_v4 = vpop.permute.xlu0 %1437 }
 0x387   : > { %v1480_v44 = vsel %vm483_vm3, %v1428_v37, 0.0  ;;  %v1495_v22 = vsel %vm483_vm3, %v1438_v4, 0.0 }
 0x388   : > { %1475 = vadd.xlane.f32.xlu0 %v1474_v24 }
 0x38a   : > { %v1432_v63 = vpop.permute.xlu1 %1431  ;;  %v1442_v36 = vpop.permute.xlu0 %1441 }
 0x38b   : > { %v1486_v45 = vsel %vm483_vm3, %v1432_v63, 0.0  ;;  %v1501_v49 = vsel %vm483_vm3, %v1442_v36, 0.0 }
 0x38c   : > { %1478 = vadd.xlane.f32.xlu0 %v1477_v7 }
 0x38e   : > { %v1436_v30 = vpop.permute.xlu1 %1435  ;;  %v1446_v33 = vpop.permute.xlu0 %1445 }
 0x38f   : > { %v1492_v15 = vsel %vm483_vm3, %v1436_v30, 0.0  ;;  %v1507_v8 = vsel %vm483_vm3, %v1446_v33, 0.0 }
 0x390   : > { %1481 = vadd.xlane.f32.xlu0 %v1480_v44 }
 0x392   : > { %v1440_v2 = vpop.permute.xlu1 %1439 }
 0x393   : > { %v1498_v53 = vsel %vm483_vm3, %v1440_v2, 0.0 }
 0x394   : > { %1484 = vadd.xlane.f32.xlu0 %v1483_v31 }
 0x396   : > { %v1444_v40 = vpop.permute.xlu1 %1443 }
 0x397   : > { %v1504_v0 = vsel %vm483_vm3, %v1444_v40, 0.0 }
 0x398   : > { %1487 = vadd.xlane.f32.xlu0 %v1486_v45 }
 0x39a   : > { %v1448_v38 = vpop.permute.xlu1 %1447 }
 0x39b   : > { %v1510_v57 = vsel %vm483_vm3, %v1448_v38, 0.0 }
 0x39c   : > { %1490 = vadd.xlane.f32.xlu0 %v1489_v43 }
 0x3a0   : > { %1493 = vadd.xlane.f32.xlu0 %v1492_v15 }
 0x3a4   : > { %1496 = vadd.xlane.f32.xlu0 %v1495_v22 }
 0x3a8   : > { %1499 = vadd.xlane.f32.xlu0 %v1498_v53 }
 0x3ac   : > { %1502 = vadd.xlane.f32.xlu0 %v1501_v49 }
 0x3ae   : > { %v904_v27 = vpop.xlane.xlu0 %903 }
 0x3af   : > { %2552 = vrcp.f32 %v904_v27 }
 0x3b0   : > { %1505 = vadd.xlane.f32.xlu0 %v1504_v0 }
 0x3b4   : > { %1508 = vadd.xlane.f32.xlu0 %v1507_v8 }
 0x3b8   : > { %1511 = vadd.xlane.f32.xlu0 %v1510_v57 }
 0x3bc   : > { %v2553_v22 = vpop.eup %2552 }
 0x3cb   : > { %v907_v48 = vpop.xlane.xlu1 %906 }
 0x3cc   : > { %2554 = vrcp.f32 %v907_v48 }
 0x3cf   : > { %v910_v21 = vpop.xlane.xlu1 %909 }
 0x3d3   : > { %v913_v18 = vpop.xlane.xlu1 %912 }
 0x3d7   : > { %v916_v58 = vpop.xlane.xlu1 %915 }
 0x3d9   : > { %v2555_v2 = vpop.eup %2554 }
 0x3db   : > { %v919_v55 = vpop.xlane.xlu1 %918 }
 0x3df   : > { %v922_v24 = vpop.xlane.xlu1 %921 }
 0x3e3   : > { %v925_v7 = vpop.xlane.xlu1 %924 }
 0x3e7   : > { %v928_v14 = vpop.xlane.xlu1 %927 }
 0x3eb   : > { %v931_v63 = vpop.xlane.xlu1 %930 }
 0x3ee   : > { %v2341_v19 = vpop.f32.mrf.mxu1 }
 0x3ef   : > { %1956 = vst.msk [vmem:[%s2830_s29 + $0x8] sm:$0xff] %vm361_vm1, %v2341_v19  ;;  %v934_v43 = vpop.xlane.xlu1 %933  ;;  %v967_v19 = vmul.f32 %v2555_v2, %v3859_v56 }
 0x3f0   : > { %v1876_v23 = vpop.f32.mrf.mxu1 }
 0x3f1   : > { %1955 = vst.msk [vmem:[%s2830_s29] sm:$0xff] %vm361_vm1, %v1876_v23 }
 0x3f2   : > { %v2344_v16 = vpop.f32.mrf.mxu1 }
 0x3f3   : > { %1958 = vst.msk [vmem:[%s2830_s29 + $0x18] sm:$0xff] %vm361_vm1, %v2344_v16  ;;  %v937_v15 = vpop.xlane.xlu1 %936 }
 0x3f4   : > { %v1886_v1 = vpop.f32.mrf.mxu1 }
 0x3f5   : > { %1957 = vst.msk [vmem:[%s2830_s29 + $0x10] sm:$0xff] %vm361_vm1, %v1886_v1 }
 0x3f7   : > { %v940_v0 = vpop.xlane.xlu1 %939 }
 0x405   : > { %v1467_v25 = vpop.xlane.xlu0 %1466 }
 0x409   : > { %v1470_v54 = vpop.xlane.xlu0 %1469 }
 0x40a   : > { %2556 = vrcp.f32 %v1470_v54 }
 0x40b   : > { %2558 = vrcp.f32 %v1467_v25  ;;  %v943_v25 = vpop.xlane.xlu1 %942 }
 0x40d   : > { %v1473_v37 = vpop.xlane.xlu0 %1472 }
 0x40e   : > { %2560 = vrcp.f32 %v1473_v37 }
 0x40f   : > { %2562 = vrcp.f32 %v910_v21 }
 0x411   : > { %v1476_v44 = vpop.xlane.xlu0 %1475 }
 0x412   : > { %2564 = vrcp.f32 %v1476_v44 }
 0x413   : > { %2566 = vrcp.f32 %v913_v18 }
 0x415   : > { %v1479_v31 = vpop.xlane.xlu0 %1478 }
 0x416   : > { %2568 = vrcp.f32 %v1479_v31 }
 0x417   : > { %2570 = vrcp.f32 %v916_v58  ;;  %v2557_v53 = vpop.eup %2556 }
 0x418   : > { %v2559_v49 = vpop.eup %2558  ;;  %v1530_v8 = vmul.f32 %v2557_v53, %v3717_v60  ;;  %v966_v60 = vmul.f32 %v2553_v22, %v3782_v11  ;;  %v946_v53 = vpop.xlane.xlu1 %945 }
 0x419   : > { %v1482_v45 = vpop.xlane.xlu0 %1481  ;;  %v1529_v21 = vmul.f32 %v2559_v49, %v3707_v51 }
 0x41a   : > { %2572 = vrcp.f32 %v1482_v45  ;;  %v1626_v27 = vsel %vm483_vm3, %v967_v19, %v1530_v8 }
 0x41b   : > { %2574 = vrcp.f32 %v919_v55  ;;  %v2561_v40 = vpop.eup %2560  ;;  %v1743_v44 = vmul.f32 %v3800_v39, %v1626_v27  ;;  %v4599_v27 = vld [vmem:[#allocation65_spill] sm:$0xff] }
 0x41c   : > { %v2563_v33 = vpop.eup %2562  ;;  %v1531_v23 = vmul.f32 %v2561_v40, %v3636_v28  ;;  %v4596_v40 = vld [vmem:[#allocation22_spill] sm:$0xff] }
 0x41d   : > { %v1485_v35 = vpop.xlane.xlu0 %1484  ;;  %v968_v58 = vmul.f32 %v2563_v33, %v3865_v47  ;;  %v4597_v33 = vld [vmem:[#allocation11_spill] sm:$0xff] }
 0x41e   : > { %2576 = vrcp.f32 %v1485_v35 }
 0x41f   : > { %2578 = vrcp.f32 %v922_v24  ;;  %v2565_v38 = vpop.eup %2564  ;;  %v1627_v11 = vsel %vm483_vm3, %v968_v58, %v1531_v23 }
 0x420   : > { %v2567_v48 = vpop.eup %2566  ;;  %v1532_v56 = vmul.f32 %v2565_v38, %v3727_v6 }
 0x421   : > { %v1488_v30 = vpop.xlane.xlu0 %1487  ;;  %v969_v28 = vmul.f32 %v2567_v48, %v3869_v50  ;;  %v4598_v48 = vld [vmem:[#allocation62_spill] sm:$0xff] }
 0x422   : > { %2580 = vrcp.f32 %v1488_v30 }
 0x423   : > { %2582 = vrcp.f32 %v925_v7  ;;  %v2569_v1 = vpop.eup %2568  ;;  %v1625_v7 = vsel %vm483_vm3, %v966_v60, %v1529_v21  ;;  %v1628_v31 = vsel %vm483_vm3, %v969_v28, %v1532_v56  ;;  %v4600_v28 = vld [vmem:[#allocation27_spill] sm:$0xff] }
 0x424   : > { %v2571_v18 = vpop.eup %2570  ;;  %v1533_v47 = vmul.f32 %v2569_v1, %v3652_v29  ;;  %v1742_v29 = vmul.f32 %v3804_v17, %v1625_v7  ;;  %v4595_v17 = vld [vmem:[#allocation9_spill] sm:$0xff] }
 0x425   : > { %v1491_v4 = vpop.xlane.xlu0 %1490  ;;  %v1745_v49 = vmul.f32 %v4595_v17, %v1628_v31 }
 0x426   : > { %2584 = vrcp.f32 %v1491_v4  ;;  %v4594_v4 = vld [vmem:[#allocation63_spill] sm:$0xff]  ;;  %v2008_v21 = vsel %vm361_vm1, %v1742_v29, 0.0 }
 0x427   : > { %2586 = vrcp.f32 %v928_v14  ;;  %v2573_v55 = vpop.eup %2572  ;;  %v970_v14 = vmul.f32 %v2571_v18, %v3877_v62 }
 0x428   : > { %v2575_v54 = vpop.eup %2574 }
 0x429   : > { %v1494_v36 = vpop.xlane.xlu0 %1493  ;;  %v1629_v62 = vsel %vm483_vm3, %v970_v14, %v1533_v47  ;;  %v4601_v47 = vld [vmem:[#allocation32_spill] sm:$0xff]  ;;  %v949_v14 = vpop.xlane.xlu1 %948 }
 0x42a   : > { %2588 = vrcp.f32 %v1494_v36  ;;  %v2009_v36 = vsel %vm361_vm1, %v1743_v44, 0.0  ;;  %v4602_v44 = vld [vmem:[#allocation15_spill] sm:$0xff] }
 0x42b   : > { %2590 = vrcp.f32 %v931_v63  ;;  %v2577_v37 = vpop.eup %2576  ;;  %v1534_v63 = vmul.f32 %v2573_v55, %v3739_v41  ;;  %v2010_v60 = vadd.f32 %v2009_v36, %v2008_v21  ;;  %v4607_v21 = vld [vmem:[#allocation10_spill] sm:$0xff] }
 0x42c   : > { %v2579_v50 = vpop.eup %2578  ;;  %v1535_v22 = vmul.f32 %v2577_v37, %v4594_v4 }
 0x42d   : > { %v1497_v57 = vpop.xlane.xlu0 %1496  ;;  %v2347_v16 = vpop.f32.mrf.mxu1 }
 0x42e   : > { %2592 = vrcp.f32 %v1497_v57  ;;  %1960 = vst.msk [vmem:[%s2830_s29 + $0x28] sm:$0xff] %vm361_vm1, %v2347_v16  ;;  %v1746_v16 = vmul.f32 %v4025_v13, %v1629_v62  ;;  %v4604_v62 = vld [vmem:[#allocation45_spill] sm:$0xff] }
 0x42f   : > { %2594 = vrcp.f32 %v934_v43  ;;  %v1896_v51 = vpop.f32.mrf.mxu1  ;;  %v2581_v35 = vpop.eup %2580  ;;  %v1744_v43 = vmul.f32 %v3797_v20, %v1627_v11 }
 0x430   : > { %2596 = vrcp.f32 %v937_v15  ;;  %1959 = vst.msk [vmem:[%s2830_s29 + $0x20] sm:$0xff] %vm361_vm1, %v1896_v51  ;;  %v2583_v30 = vpop.eup %2582  ;;  %v971_v15 = vmul.f32 %v2575_v54, %v3887_v34  ;;  %v1536_v8 = vmul.f32 %v2581_v35, %v4597_v33  ;;  %v2015_v31 = vsel %vm361_vm1, %v1746_v16, 0.0 }
 0x431   : > { %v1500_v24 = vpop.xlane.xlu0 %1499  ;;  %v2350_v6 = vpop.f32.mrf.mxu1  ;;  %v973_v19 = vmul.f32 %v2583_v30, %v4598_v48  ;;  %v2011_v23 = vsel %vm361_vm1, %v1744_v43, 0.0  ;;  %v4603_v43 = vld [vmem:[#allocation24_spill] sm:$0xff] }
 0x432   : > { %2598 = vrcp.f32 %v1500_v24  ;;  %1962 = vst.msk [vmem:[%s2830_s29 + $0x38] sm:$0xff] %vm361_vm1, %v2350_v6  ;;  %v1630_v34 = vsel %vm483_vm3, %v971_v15, %v1534_v63  ;;  %v2013_v24 = vsel %vm361_vm1, %v1745_v49, 0.0  ;;  %v2012_v7 = vadd.f32 %v2011_v23, %v2010_v60 }
 0x433   : > { %2600 = vrcp.f32 %v940_v0  ;;  %v1906_v45 = vpop.f32.mrf.mxu1  ;;  %v2585_v41 = vpop.eup %2584  ;;  %v972_v0 = vmul.f32 %v2579_v50, %v4596_v40  ;;  %v1747_v54 = vmul.f32 %v4028_v9, %v1630_v34  ;;  %v1632_v11 = vsel %vm483_vm3, %v973_v19, %v1536_v8  ;;  %v4606_v34 = vld [vmem:[#allocation43_spill] sm:$0xff] }
 0x434   : > { %1961 = vst.msk [vmem:[%s2830_s29 + $0x30] sm:$0xff] %vm361_vm1, %v1906_v45  ;;  %v2587_v20 = vpop.eup %2586  ;;  %v1537_v56 = vmul.f32 %v2585_v41, %v4599_v27  ;;  %v2014_v35 = vadd.f32 %v2013_v24, %v2012_v7  ;;  %v4609_v24 = vld [vmem:[#allocation51_spill] sm:$0xff]  ;;  %v4610_v7 = vld [vmem:[#allocation60_spill] sm:$0xff] }
 0x435   : > { %v1503_v39 = vpop.xlane.xlu0 %1502  ;;  %v2353_v2 = vpop.f32.mrf.mxu1  ;;  %v1631_v58 = vsel %vm483_vm3, %v972_v0, %v1535_v22  ;;  %v2017_v22 = vsel %vm361_vm1, %v1747_v54, 0.0 }
 0x436   : > { %2602 = vrcp.f32 %v1503_v39  ;;  %1964 = vst.msk [vmem:[%s2830_s29 + $0x48] sm:$0xff] %vm361_vm1, %v2353_v2  ;;  %v1748_v63 = vmul.f32 %v4017_v5, %v1631_v58  ;;  %v1749_v2 = vmul.f32 %v4021_v59, %v1632_v11  ;;  %v2016_v5 = vadd.f32 %v2015_v31, %v2014_v35 }
 0x437   : > { %2604 = vrcp.f32 %v943_v25  ;;  %v1916_v38 = vpop.f32.mrf.mxu1  ;;  %v2589_v57 = vpop.eup %2588  ;;  %v974_v25 = vmul.f32 %v2587_v20, %v4600_v28 }
 0x438   : > { %1963 = vst.msk [vmem:[%s2830_s29 + $0x40] sm:$0xff] %vm361_vm1, %v1916_v38  ;;  %v2591_v18 = vpop.eup %2590  ;;  %v1538_v6 = vmul.f32 %v2589_v57, %v4601_v47  ;;  %v2019_v20 = vsel %vm361_vm1, %v1748_v63, 0.0  ;;  %v2018_v33 = vadd.f32 %v2017_v22, %v2016_v5  ;;  %v2021_v48 = vsel %vm361_vm1, %v1749_v2, 0.0  ;;  %v4611_v63 = vld [vmem:[#allocation20_spill] sm:$0xff]  ;;  %v4613_v22 = vld [vmem:[#allocation30_spill] sm:$0xff]  ;;  %v4614_v5 = vld [vmem:[#allocation25_spill] sm:$0xff] }
 0x439   : > { %v1506_v1 = vpop.xlane.xlu0 %1505  ;;  %v2356_v51 = vpop.f32.mrf.mxu1  ;;  %v975_v50 = vmul.f32 %v2591_v18, %v4602_v44  ;;  %v1633_v29 = vsel %vm483_vm3, %v974_v25, %v1537_v56 }
 0x43a   : > { %2606 = vrcp.f32 %v1506_v1  ;;  %1966 = vst.msk [vmem:[%s2830_s29 + $0x58] sm:$0xff] %vm361_vm1, %v2356_v51  ;;  %v1750_v40 = vmul.f32 %v4032_v12, %v1633_v29  ;;  %v2020_v23 = vadd.f32 %v2019_v20, %v2018_v33  ;;  %v4608_v1 = vld [vmem:[#allocation8_spill] sm:$0xff] }
 0x43b   : > { %v2593_v55 = vpop.eup %2592  ;;  %2608 = vrcp.f32 %v946_v53  ;;  %v1926_v37 = vpop.f32.mrf.mxu1  ;;  %v1634_v41 = vsel %vm483_vm3, %v975_v50, %v1538_v6  ;;  %v4605_v53 = vld [vmem:[#allocation13_spill] sm:$0xff] }
 0x43c   : > { %v2595_v13 = vpop.eup %2594  ;;  %1965 = vst.msk [vmem:[%s2830_s29 + $0x50] sm:$0xff] %vm361_vm1, %v1926_v37  ;;  %v1539_v39 = vmul.f32 %v2593_v55, %v4603_v43  ;;  %v1751_v19 = vmul.f32 %v4037_v26, %v1634_v41  ;;  %v2023_v27 = vsel %vm361_vm1, %v1750_v40, 0.0  ;;  %v2022_v51 = vadd.f32 %v2021_v48, %v2020_v23 }
 0x43d   : > { %v1509_v9 = vpop.xlane.xlu0 %1508  ;;  %v2597_v45 = vpop.eup %2596  ;;  %v976_v4 = vmul.f32 %v2595_v13, %v4604_v62 }
 0x43e   : > { %2610 = vrcp.f32 %v1509_v9  ;;  %v2359_v30 = vpop.f32.mrf.mxu1  ;;  %v977_v59 = vmul.f32 %v2597_v45, %v4606_v34  ;;  %v2025_v28 = vsel %vm361_vm1, %v1751_v19, 0.0  ;;  %v2024_v13 = vadd.f32 %v2023_v27, %v2022_v51  ;;  %v4612_v45 = vld [vmem:[#allocation29_spill] sm:$0xff] }
 0x43f   : > { %v2599_v15 = vpop.eup %2598  ;;  %1968 = vst.msk [vmem:[%s2830_s29 + $0x68] sm:$0xff] %vm361_vm1, %v2359_v30  ;;  %2612 = vrcp.f32 %v949_v14  ;;  %v1635_v8 = vsel %vm483_vm3, %v976_v4, %v1539_v39  ;;  %v2002_v39 = vrot.slane %v4143_v42, 4 }
 0x440   : > { %v1540_v36 = vmul.f32 %v2599_v15, %v4605_v53  ;;  %v1936_v17 = vpop.f32.mrf.mxu1  ;;  %v2601_v49 = vpop.eup %2600  ;;  %v1752_v56 = vmul.f32 %v4040_v32, %v1635_v8  ;;  %v2026_v37 = vadd.f32 %v2025_v28, %v2024_v13 }
 0x441   : > { %1967 = vst.msk [vmem:[%s2830_s29 + $0x60] sm:$0xff] %vm361_vm1, %v1936_v17  ;;  %v1512_v0 = vpop.xlane.xlu0 %1511  ;;  %v978_v12 = vmul.f32 %v2601_v49, %v4607_v21  ;;  %v2045_v21 = vld [vmem:[%s2832_s28] sm:$0x3] }
 0x442   : > { %2614 = vrcp.f32 %v1512_v0  ;;  %v2362_v38 = vpop.f32.mrf.mxu1  ;;  %v1636_v16 = vsel %vm483_vm3, %v977_v59, %v1540_v36  ;;  %v2027_v6 = vsel %vm361_vm1, %v1752_v56, 0.0  ;;  %v2003_v36 = vadd.f32 %v2002_v39, %v4143_v42 }
 0x443   : > { %v2603_v57 = vpop.eup %2602  ;;  %1970 = vst.msk [vmem:[%s2830_s29 + $0x78] sm:$0xff] %vm361_vm1, %v2362_v38  ;;  %v1753_v25 = vmul.f32 %v4043_v52, %v1636_v16  ;;  %v2028_v9 = vadd.f32 %v2027_v6, %v2026_v37 }
 0x444   : > { %v1541_v18 = vmul.f32 %v2603_v57, %v4608_v1  ;;  %v1946_v60 = vpop.f32.mrf.mxu1  ;;  %v2605_v58 = vpop.eup %2604  ;;  %v2004_v0 = vrot.slane %v2003_v36, 2 }
 0x445   : > { %1969 = vst.msk [vmem:[%s2830_s29 + $0x70] sm:$0xff] %vm361_vm1, %v1946_v60  ;;  %v979_v54 = vmul.f32 %v2605_v58, %v4609_v24  ;;  %v2029_v14 = vsel %vm361_vm1, %v1753_v25, 0.0  ;;  %s2278_s29 = sshll.u32 %s2696_s22, 5  ;;  %s2622_s22 = scalar_lea.vmem %s2621_s14, 64 }
 0x446   : > { %v1637_v26 = vsel %vm483_vm3, %v978_v12, %v1541_v18  ;;  %v2030_v30 = vadd.f32 %v2029_v14, %v2028_v9  ;;  %v2005_v33 = vadd.f32 %v2004_v0, %v2003_v36  ;;  %s2076_s27 = scalar_lea.hbm %s4326_s5, %s2278_s29  ;;  %p2624_p5 = scmp.lt.s32.totalorder %s2622_s22, %s2616_s8 }
 0x447   : > { %v2607_v55 = vpop.eup %2606  ;;  %v1754_v32 = vmul.f32 %v4065_v46, %v1637_v26 }
 0x448   : > { %v1542_v11 = vmul.f32 %v2607_v55, %v4610_v7  ;;  %v2609_v47 = vpop.eup %2608  ;;  %v2006_v42 = vrot.slane %v2005_v33, 1  ;;  %p2625_p6 = por %p2624_p5, %p2623_p4 }
 0x449   : > { %v980_v52 = vmul.f32 %v2609_v47, %v4611_v63  ;;  %v2031_v43 = vsel %vm361_vm1, %v1754_v32, 0.0 }
 0x44a   : > { %v1638_v44 = vsel %vm483_vm3, %v979_v54, %v1542_v11  ;;  %v2032_v2 = vadd.f32 %v2031_v43, %v2030_v30  ;;  %v2007_v19 = vadd.f32 %v2006_v42, %v2005_v33  ;;  %p2626_p7 = pnand %p2625_p6, %p2619_p2 }
 0x44b   : > { %v2611_v50 = vpop.eup %2610  ;;  %v1755_v31 = vmul.f32 %v4084_v10, %v1638_v44 }
 0x44c   : > { %v1543_v35 = vmul.f32 %v2611_v50, %v4612_v45  ;;  %v2613_v29 = vpop.eup %2612 }
 0x44d   : > { %v2033_v62 = vsel %vm361_vm1, %v1755_v31, 0.0  ;;  %v981_v10 = vmul.f32 %v2613_v29, %v4613_v22 }
 0x44e   : > { %v1639_v46 = vsel %vm483_vm3, %v980_v52, %v1543_v35  ;;  %v2034_v49 = vadd.f32 %v2033_v62, %v2032_v2 }
 0x44f   : > { %v2615_v15 = vpop.eup %2614  ;;  %v1756_v4 = vmul.f32 %v4118_v61, %v1639_v46 }
 0x450   : > { %v1544_v41 = vmul.f32 %v2615_v15, %v4614_v5 }
 0x451   : > { %v2035_v53 = vsel %vm361_vm1, %v1756_v4, 0.0 }
 0x452   : > { %v1640_v17 = vsel %vm483_vm3, %v981_v10, %v1544_v41  ;;  %v2036_v40 = vadd.f32 %v2035_v53, %v2034_v49  ;;  %vm2046_vm3 = vcmask 1040384  }
 0x453   : > { %v1757_v20 = vmul.f32 %v4129_v3, %v1640_v17 }
 0x455   : > { %v2037_v61 = vsel %vm361_vm1, %v1757_v20, 0.0  ;;  %vm2049_vm1 = vcmask 254976  }
 0x456   : > { %v2038_v34 = vadd.f32 %v2037_v61, %v2036_v40 }
 0x458   : > { %v2039_v59 = vrot.slane %v2038_v34, 4 }
 0x45a   : > { %v2040_v8 = vadd.f32 %v2039_v59, %v2038_v34 }
 0x45c   : > { %v2041_v38 = vrot.slane %v2040_v8, 2 }
 0x45e   : > { %v2042_v57 = vadd.f32 %v2041_v38, %v2040_v8 }
 0x460   : > { %v2043_v48 = vrot.slane %v2042_v57, 1 }
 0x462   : > { %v2044_v3 = vadd.f32 %v2043_v48, %v2042_v57 }
 0x464   : > { %v2047_v12 = vsel %vm2046_vm3, %v2007_v19, %v2044_v3 }
 0x465   : > { %v2048_v23 = vadd.f32 %v2047_v12, %v2045_v21 }
 0x467   : > { %2050 = vst.msk [vmem:[%s2832_s28] sm:$0x3] %vm2049_vm1, %v2048_v23 }
 0x468   : > { %2629 = shalt.err (!%p2626_p7)
}
 0x469   : > { %s2630_s12 = scalar_lea.hbm %s2076_s27, 32  ;;  %s2634_s15 = scalar_lea.hbm %s4326_s5, 64 }
 0x46a   : > { %p2631_p8 = scmp.ne.s32.totalorder %s2076_s27, %s2630_s12  ;;  %p2635_p12 = scmp.lt.s32.totalorder %s2076_s27, %s4326_s5 }
 0x46b   : > { %p2636_p13 = scmp.lt.s32.totalorder %s2634_s15, %s2630_s12 }
 0x46c   : > { %p2632_p10 = pnand %p2631_p8, %p2794_p3 }
 0x46d   : > { %p2637_p0 = por %p2636_p13, %p2635_p12 }
 0x46e   : > { %p2633_p11 = pneg %p2632_p10 }
 0x470   : > { %p2638_p1 = pnand %p2637_p0, %p2633_p11 }
 0x472   : > { %2641 = shalt.err (!%p2638_p1)
}
 0x473   : > { %2363 = dma.vmem_to_hbm [thread:$0]  (%p2794_p3), %s2079_s13, 32, %s2076_s27, %s2059_s7  }
 0x474 PF: > { %p2369_p2 = scmp.ge.s32.totalorder %s2708_s25, 2  ;;  %s2100_s29 = sand.u32 1, %s2680_s18  }
 0x475   : > { %s2101_s17 = scalar_lea.sflag [#allocation3], %s2100_s29 }
 0x476   : > { %p2366_p4 = pnand %p2369_p2, %p2804_p9 }
 0x478   : > { %p2367_p5 = pneg %p2366_p4 }
 0x47a   : > { %2675 = dma.done.wait (%p2367_p5), %s2101_s17, 32  }
 0x47b   : > { %2677 = vsyncadd (%p2367_p5), %s2101_s17, 4294967264  ;;  %s19_s25 = sadd.s32 1, %s2708_s25   ;;  %s4615_s30 = sld [smem:[#allocation5_spill]] }
 0x47c   : > { %p16_p6 = scmp.ge.s32.totalorder %s19_s25, 6   ;;  %s4616_s13 = sld [smem:[#allocation6_spill]] }
 0x47d   : > { %s4617_s18 = smov %s2684_s19  ;;  %s4618_s19 = smov %s2688_s20 }
 0x47e   : > { %s4619_s20 = smov %s2812_s9  ;;  %s4620_s21 = smov %s2700_s23 }
 0x47f   : > { %s4621_s22 = smov %s2704_s24  ;;  %18 = sbr.rel (!%p16_p6) target bundleno = 5 (0x5), region = 87 }
 0x481   : > { %s4622_s23 = smov %s4615_s30 }
 0x482   : > { %s4623_s24 = smov %s4616_s13 }
 0x484   :  { %2106 = vsyncpa [#allocation3], 1 }
 0x485   :  { %2108 = vsyncpa [#allocation3 + $0x1], 1 }

</bundles_post_ra>
